<compile_context>
chip_gen: v6e
topology: v6e:2x2x1
jax: 0.10.0
libtpu: 0.0.40
codegen_flags: <defaults>
</compile_context>

<pallas_src>
import functools
import math

import jax
import jax.numpy as jnp
from jax import lax
from jax.experimental import pallas as pl
from jax.experimental.pallas import tpu as pltpu

# ------------------------------ config -------------------------------------
B, S, E = 2, 8, 32          # batch, seq, hidden_size (= query/key/value size)
HEADS = 4
DH = E // HEADS
FFN = 64                    # ffn_hidden_size (ffn_output_size == E)
KN = 1023                   # knowledge_dim hardcoded in Encoder_Block
KN_PAD = 1024               # knowledge length padded to 8*128 lanes
EPS = 1e-5                  # nn.LayerNorm default
NEG = -1e30                 # "minus infinity" for masked softmax scores


# ------------------------------ math helpers --------------------------------
_INV_SQRT2 = 1.0 / math.sqrt(2.0)


def _erf_poly(x):
    # Abramowitz & Stegun 7.1.26, |err| <= 1.5e-7 (negligible for GELU here).
    # Built only from exp/mul/add/where, so it always lowers in Mosaic.
    p = 0.3275911
    a1, a2, a3, a4, a5 = (0.254829592, -0.284496736, 1.421413741,
                          -1.453152027, 1.061405429)
    z = jnp.abs(x)
    t = 1.0 / (1.0 + p * z)
    poly = ((((a5 * t + a4) * t + a3) * t + a2) * t + a1) * t
    y = 1.0 - poly * jnp.exp(-z * z)
    return jnp.where(x >= 0, y, -y)


def _gelu_kernel(x):
    # torch.nn.GELU() default (approximate='none'): 0.5*x*(1+erf(x/sqrt(2))).
    return 0.5 * x * (1.0 + _erf_poly(x * _INV_SQRT2))


def _gelu_exact(x):
    return 0.5 * x * (1.0 + lax.erf(x * _INV_SQRT2))


def _layernorm(z, g, b):
    mu = jnp.mean(z, axis=-1, keepdims=True)
    var = jnp.mean((z - mu) * (z - mu), axis=-1, keepdims=True)
    return (z - mu) * lax.rsqrt(var + EPS) * g + b


# --------------- kernel 1: one-time knowledge K/V precompute ----------------
def _knowledge_kv_kernel(kn_ref, wkT_ref, wv_ref, kT_ref, v_ref):
    kn = kn_ref[...]                                        # (KN_PAD, E); pad row = 0
    # Knowledge K^T produced directly lane-dense (E, KN_PAD):
    # kT[i, j] = sum_c w_k[c, i] * kn[j, c] == (kn @ w_k)^T.
    kT_ref[...] = lax.dot_general(wkT_ref[...], kn, (((1,), (1,)), ((), ())),
                                  preferred_element_type=jnp.float32)
    v_ref[...] = jnp.dot(kn, wv_ref[...], preferred_element_type=jnp.float32)


def _knowledge_kv(kn_padded, w_kT, w_v):
    return pl.pallas_call(
        _knowledge_kv_kernel,
        out_shape=(jax.ShapeDtypeStruct((E, KN_PAD), jnp.float32),
                   jax.ShapeDtypeStruct((KN_PAD, E), jnp.float32)),
    )(kn_padded, w_kT, w_v)


# --------------------- kernel 2: fused encoder block ------------------------
def _encoder_block_kernel(x_ref, wqkv_ref, wo_ref, kT_ref, vkn_ref, knb_ref,
                          hm_ref, bbias_ref, ln1g_ref, ln1b_ref, w1_ref,
                          b1_ref, w2_ref, b2_ref, ln2g_ref, ln2b_ref, o_ref,
                          *, bb):
    n = bb * S
    x = x_ref[...].reshape(n, E)                            # (bb*S, E)

    # Fused Q|K|V projection of the real tokens (no bias, as in the reference).
    qkv = jnp.dot(x, wqkv_ref[...], preferred_element_type=jnp.float32)
    q, kx, vx = qkv[:, :E], qkv[:, E:2 * E], qkv[:, 2 * E:]

    # All-heads block matmuls: tile q over heads and zero the columns that do
    # not belong to each head (block-diagonal q), so single matmuls compute
    # every head's scores / PV at full MXU fill (no per-head lane slicing).
    hm = hm_ref[...]                                        # (HEADS*bb*S, E)
    qb = jnp.concatenate([q] * HEADS, axis=0) * hm          # (R, E), R=HEADS*bb*S

    # Scores: knowledge prefix (padded to 1024; pad column gets -1e30 bias)
    # and self tokens (cross-batch pairs masked with -1e30 when bb > 1).
    s_kn = (jnp.dot(qb, kT_ref[...], preferred_element_type=jnp.float32)
            + knb_ref[...])                                 # (R, KN_PAD)
    s_x = (lax.dot_general(qb, kx, (((1,), (1,)), ((), ())),
                           preferred_element_type=jnp.float32)
           + bbias_ref[...])                                # (R, bb*S)

    # Joint softmax over [knowledge ++ self] without materializing the concat.
    m = jnp.maximum(jnp.max(s_kn, axis=-1, keepdims=True),
                    jnp.max(s_x, axis=-1, keepdims=True))
    e_kn = jnp.exp(s_kn - m)
    e_x = jnp.exp(s_x - m)
    denom = (jnp.sum(e_kn, axis=-1, keepdims=True)
             + jnp.sum(e_x, axis=-1, keepdims=True))
    r = pl.reciprocal(denom, approx=True)                   # EUP slot

    # PV matmuls; normalization applied AFTER, on the small (R, E) result.
    pv = (jnp.dot(e_kn, vkn_ref[...], preferred_element_type=jnp.float32)
          + jnp.dot(e_x, vx, preferred_element_type=jnp.float32))
    pv = pv * r * hm                                        # keep own head's columns

    # Merge heads (sum of the block-diagonal pieces == concat over heads),
    # then a single output projection.
    o_cat = pv[0:n, :]
    for h in range(1, HEADS):
        o_cat = o_cat + pv[h * n:(h + 1) * n, :]
    attn = jnp.dot(o_cat, wo_ref[...], preferred_element_type=jnp.float32)

    # AddNorm 1 (dropout = identity in eval).
    y = _layernorm(x + attn, ln1g_ref[...], ln1b_ref[...])

    # PositionWiseFFN: GELU after BOTH linears (matches the reference module).
    h1 = _gelu_kernel(jnp.dot(y, w1_ref[...],
                              preferred_element_type=jnp.float32) + b1_ref[...])
    f = _gelu_kernel(jnp.dot(h1, w2_ref[...],
                             preferred_element_type=jnp.float32) + b2_ref[...])

    # AddNorm 2.
    o_ref[...] = _layernorm(y + f, ln2g_ref[...], ln2b_ref[...]).reshape(bb, S, E)


@functools.partial(jax.jit, static_argnames=("bb",))
def _encoder_forward(prep, x, bb):
    R = bb * HEADS * S
    full = lambda shp: pl.BlockSpec(shp, lambda i, _s=shp: tuple(0 for _ in _s))
    return pl.pallas_call(
        functools.partial(_encoder_block_kernel, bb=bb),
        grid=(B // bb,),
        in_specs=[
            pl.BlockSpec((bb, S, E), lambda i: (i, 0, 0)),   # x
            full((E, 3 * E)),                                # wq|wk|wv fused
            full((E, E)),                                    # w_o
            full((E, KN_PAD)),                               # knowledge K^T (padded)
            full((KN_PAD, E)),                               # knowledge V (padded)
            full((1, KN_PAD)),                               # pad-column score bias
            full((R, E)),                                    # per-head column mask
            full((R, bb * S)),                               # cross-batch score bias
            full((1, E)), full((1, E)),                      # ln1 g, b
            full((E, FFN)), full((1, FFN)),                  # ffn w1, b1
            full((FFN, E)), full((1, E)),                    # ffn w2, b2
            full((1, E)), full((1, E)),                      # ln2 g, b
        ],
        out_specs=pl.BlockSpec((bb, S, E), lambda i: (i, 0, 0)),
        out_shape=jax.ShapeDtypeStruct((B, S, E), jnp.float32),
        compiler_params=pltpu.CompilerParams(
            dimension_semantics=("parallel",)),
    )(x, prep["wqkv"], prep["w_o"], prep["kT_kn"], prep["v_kn"],
      prep["kn_bias"], prep["head_mask"], prep["batch_bias"],
      prep["ln1_g"], prep["ln1_b"], prep["ffn_w1"], prep["ffn_b1"],
      prep["ffn_w2"], prep["ffn_b2"], prep["ln2_g"], prep["ln2_b"])


def _tensorcores_per_device():
    """Best-effort TensorCore count reachable by one grid (megacore/v7x = 2)."""
    try:
        kind = jax.devices()[0].device_kind.lower()
    except Exception:
        return 1
    return 2 if any(t in kind for t in ("v7", "7x", "v4", "v5p")) else 1


def make_encoder_block(params, bb=None):
    """One-time prep (hoisted out of the hot path).  Returns fwd(x) that does
    exactly one pallas_call per forward.  bb = batch elements folded into a
    grid step: bb=B (grid=(1,)) on single-TC chips, bb=1 (parallel grid=(B,))
    when two TensorCores can share the grid."""
    if bb is None:
        bb = 1 if _tensorcores_per_device() >= 2 else B
    assert B % bb == 0

    # Pad knowledge tokens with one zero row -> K^T pad column and V pad row
    # are exactly zero; the pad score is pushed to -1e30 via kn_bias below.
    kn_pad = jnp.pad(params["knowledge"][0].astype(jnp.float32),
                     ((0, KN_PAD - KN), (0, 0)))
    kT_kn, v_kn = _knowledge_kv(kn_pad, params["w_k"].T, params["w_v"])

    R = bb * HEADS * S
    row_head = jnp.arange(R)[:, None] // (bb * S)
    col_head = jnp.arange(E)[None, :] // DH
    row_batch = (jnp.arange(R)[:, None] % (bb * S)) // S
    col_batch = jnp.arange(bb * S)[None, :] // S

    prep = {
        "wqkv": jnp.concatenate([params["w_q"], params["w_k"], params["w_v"]],
                                axis=1),
        "w_o": params["w_o"],
        "kT_kn": kT_kn,
        "v_kn": v_kn,
        "kn_bias": jnp.where(jnp.arange(KN_PAD)[None, :] >= KN, NEG,
                             0.0).astype(jnp.float32),
        "head_mask": (row_head == col_head).astype(jnp.float32),
        "batch_bias": jnp.where(row_batch == col_batch, 0.0,
                                NEG).astype(jnp.float32),
        "ln1_g": params["ln1_g"].reshape(1, E),
        "ln1_b": params["ln1_b"].reshape(1, E),
        "ffn_w1": params["ffn_w1"],
        "ffn_b1": params["ffn_b1"].reshape(1, FFN),
        "ffn_w2": params["ffn_w2"],
        "ffn_b2": params["ffn_b2"].reshape(1, E),
        "ln2_g": params["ln2_g"].reshape(1, E),
        "ln2_b": params["ln2_b"].reshape(1, E),
    }

    def fwd(x):
        return _encoder_forward(prep, x, bb)

    return fwd


# --------------------------- pure-JAX reference ------------------------------
def encoder_block_ref(params, X):
    kn = jnp.broadcast_to(params["knowledge"], (B, KN, E))
    key = jnp.concatenate([kn, X], axis=1)
    q = X @ params["w_q"]
    k = key @ params["w_k"]
    v = key @ params["w_v"]

    def split_heads(t):
        b, s, _ = t.shape
        return t.reshape(b, s, HEADS, DH).transpose(0, 2, 1, 3).reshape(
            b * HEADS, s, DH)

    qh, kh, vh = split_heads(q), split_heads(k), split_heads(v)
    score = jnp.einsum("bqd,bkd->bqk", qh, kh)          # no 1/sqrt(d) scaling
    w = jax.nn.softmax(score, axis=-1)
    o = jnp.einsum("bqk,bkd->bqd", w, vh)
    o = o.reshape(B, HEADS, S, DH).transpose(0, 2, 1, 3).reshape(B, S, E)
    attn = o @ params["w_o"]
    y = _layernorm(X + attn, params["ln1_g"], params["ln1_b"])
    h1 = _gelu_exact(y @ params["ffn_w1"] + params["ffn_b1"])
    f = _gelu_exact(h1 @ params["ffn_w2"] + params["ffn_b2"])
    return _layernorm(y + f, params["ln2_g"], params["ln2_b"])


# --------------------------------- main --------------------------------------
def init_params(key):
    ks = jax.random.split(key, 9)
    n = lambda k, shp, s: (s * jax.random.normal(k, shp)).astype(jnp.float32)
    return {
        "knowledge": n(ks[0], (1, KN, E), 1.0),          # torch.randn
        "w_q": n(ks[1], (E, E), E ** -0.5),
        "w_k": n(ks[2], (E, E), E ** -0.5),
        "w_v": n(ks[3], (E, E), E ** -0.5),
        "w_o": n(ks[4], (E, E), E ** -0.5),
        "ln1_g": jnp.ones((E,), jnp.float32),
        "ln1_b": jnp.zeros((E,), jnp.float32),
        "ffn_w1": n(ks[5], (E, FFN), E ** -0.5),
        "ffn_b1": n(ks[6], (FFN,), 0.1),
        "ffn_w2": n(ks[7], (FFN, E), FFN ** -0.5),
        "ffn_b2": n(ks[8], (E,), 0.1),
        "ln2_g": jnp.ones((E,), jnp.float32),
        "ln2_b": jnp.zeros((E,), jnp.float32),
    }


if __name__ == "__main__":
    key = jax.random.PRNGKey(0)
    pkey, xkey = jax.random.split(key)
    params = init_params(pkey)
    x = jax.random.normal(xkey, (B, S, E), dtype=jnp.float32)

    # TODO(synk): nn.Dropout is identity in eval mode, so it is not modeled.
    fwd = make_encoder_block(params)           # one-time prep, outside hot path
    out = jax.block_until_ready(fwd(x))        # hot path: ONE pallas_call

    ref = encoder_block_ref(params, x)
    assert out.shape == (B, S, E) and out.dtype == jnp.float32
    assert bool(jnp.all(jnp.isfinite(out)))
    max_err = float(jnp.max(jnp.abs(out - ref)))
    assert bool(jnp.allclose(out, ref, atol=2e-2, rtol=2e-2)), max_err
    print("KERNEL_OK")
</pallas_src>

<mosaic_0001>
module attributes {stable_mosaic.version = 11 : i64} {
  func.func @_knowledge_kv_kernel(%arg0: memref<1024x32xf32, #tpu.memory_space<vmem>>, %arg1: memref<32x32xf32, #tpu.memory_space<vmem>>, %arg2: memref<32x32xf32, #tpu.memory_space<vmem>>, %arg3: memref<32x1024xf32, #tpu.memory_space<vmem>>, %arg4: memref<1024x32xf32, #tpu.memory_space<vmem>>) attributes {dimension_semantics = [], scalar_prefetch = 0 : i64, scratch_operands = 0 : i64, tpu.core_type = #tpu.core_type<tc>} {
    %c0 = arith.constant 0 : index
    %c0_0 = arith.constant 0 : index
    %0 = vector.load %arg0[%c0, %c0_0] : memref<1024x32xf32, #tpu.memory_space<vmem>>, vector<1024x32xf32>
    %c0_1 = arith.constant 0 : index
    %c0_2 = arith.constant 0 : index
    %1 = vector.load %arg1[%c0_1, %c0_2] : memref<32x32xf32, #tpu.memory_space<vmem>>, vector<32x32xf32>
    %cst = arith.constant dense<0.000000e+00> : vector<32x1024xf32>
    %2 = tpu.matmul %1, %0, %cst {dimension_numbers = #tpu.dot_dimension_numbers<[1], [1], [0], [0], [0, 0, 1, 0], [], []>} : vector<32x32xf32>, vector<1024x32xf32>, vector<32x1024xf32> -> vector<32x1024xf32>
    %c0_3 = arith.constant 0 : index
    %c0_4 = arith.constant 0 : index
    %3 = vector.load %arg3[%c0_3, %c0_4] : memref<32x1024xf32, #tpu.memory_space<vmem>>, vector<32x1024xf32>
    tpu.vector_store %arg3[%c0_3, %c0_4], %2 {strides = array<i32>} : memref<32x1024xf32, #tpu.memory_space<vmem>>, vector<32x1024xf32>,
    %c0_5 = arith.constant 0 : index
    %c0_6 = arith.constant 0 : index
    %4 = vector.load %arg2[%c0_5, %c0_6] : memref<32x32xf32, #tpu.memory_space<vmem>>, vector<32x32xf32>
    %cst_7 = arith.constant dense<0.000000e+00> : vector<1024x32xf32>
    %5 = tpu.matmul %0, %4, %cst_7 {dimension_numbers = #tpu.dot_dimension_numbers<[1], [0], [0], [1], [0, 0, 1, 1], [], []>} : vector<1024x32xf32>, vector<32x32xf32>, vector<1024x32xf32> -> vector<1024x32xf32>
    %c0_8 = arith.constant 0 : index
    %c0_9 = arith.constant 0 : index
    %6 = vector.load %arg4[%c0_8, %c0_9] : memref<1024x32xf32, #tpu.memory_space<vmem>>, vector<1024x32xf32>
    tpu.vector_store %arg4[%c0_8, %c0_9], %5 {strides = array<i32>} : memref<1024x32xf32, #tpu.memory_space<vmem>>, vector<1024x32xf32>,
    return
  }
}

</mosaic_0001>

<bundles_post_ra>
// kernel: tpu_custom_call.1
= control target key start
LH: loop header
LB: loop body
LE: loop exit
PB: predicated region body
PF: predicated region fallthrough
CT: control target
= control target key end

     0   :  { %vm149_vm0 = vcmask 261120   ;;  %s4367_s0 = inlined_call_operand.vmem [shape: f32[1024,32], index: 0, kind: input, shape index: {}]   ;;  %s4368_s1 = inlined_call_operand.vmem [shape: f32[32,32], index: 1, kind: input, shape index: {}]   ;;  %s4369_s2 = inlined_call_operand.vmem [shape: f32[32,32], index: 2, kind: input, shape index: {}]   ;;  %s4370_s3 = inlined_call_operand.hbm [shape: f32[32,1024], index: 3, kind: output, shape index: {0}]   ;;  %s4371_s4 = inlined_call_operand.vmem [shape: f32[1024,32], index: 4, kind: output, shape index: {1}]  }
   0x1   :  { %v2619_v0 = vld [vmem:[%s4367_s0 + $0xf8] sm:$0xff]  ;;  %v2643_v4 = vld [vmem:[%s4367_s0 + $0xf0] sm:$0xff]  ;;  %v2671_v8 = vld [vmem:[%s4367_s0 + $0xe8] sm:$0xff] }
   0x2   :  { %4442 = vst [vmem:[#allocation5_spill] sm:$0xff] %v2619_v0  ;;  %v2624_v1 = vld [vmem:[%s4367_s0 + $0x1f8] sm:$0xff]  ;;  %2063 = vmatprep.subr.msk.mxu0 %vm149_vm0, %v2619_v0  ;;  %4445 = vst [vmem:[#allocation8_spill] sm:$0xff] %v2643_v4  ;;  %v2648_v5 = vld [vmem:[%s4367_s0 + $0x1f0] sm:$0xff] }
   0x3   :  { %4443 = vst [vmem:[#allocation6_spill] sm:$0xff] %v2624_v1  ;;  %v2629_v2 = vld [vmem:[%s4367_s0 + $0x78] sm:$0xff]  ;;  %2103 = vmatprep.subr.msk.mxu1 %vm149_vm0, %v2624_v1  ;;  %4446 = vst [vmem:[#allocation9_spill] sm:$0xff] %v2648_v5  ;;  %v2661_v6 = vld [vmem:[%s4367_s0 + $0x70] sm:$0xff] }
   0x4   :  { %v2638_v3 = vld [vmem:[%s4367_s0 + $0x178] sm:$0xff]  ;;  %2064 = vmatpush3.xpose.msk.msra.mxu0 %vm149_vm0, %v2629_v2  ;;  %v2666_v7 = vld [vmem:[%s4367_s0 + $0x170] sm:$0xff]  ;;  %4448 = vst [vmem:[#allocation11_spill] sm:$0xff] %v2671_v8  ;;  %v2676_v9 = vld [vmem:[%s4367_s0 + $0x1e8] sm:$0xff] }
   0x5   :  { %4444 = vst [vmem:[#allocation7_spill] sm:$0xff] %v2638_v3  ;;  %2104 = vmatpush3.xpose.msk.msra.mxu1 %vm149_vm0, %v2638_v3  ;;  %2065 = vmatprep.subr.msk.mxu0 %vm149_vm0, %v2643_v4  ;;  %4447 = vst [vmem:[#allocation10_spill] sm:$0xff] %v2666_v7  ;;  %v2689_v10 = vld [vmem:[%s4367_s0 + $0x68] sm:$0xff]  ;;  %v2699_v12 = vld [vmem:[%s4367_s0 + $0xe0] sm:$0xff] }
   0x6   :  { %2105 = vmatprep.subr.msk.mxu1 %vm149_vm0, %v2648_v5  ;;  %4449 = vst [vmem:[#allocation12_spill] sm:$0xff] %v2676_v9  ;;  %v2694_v11 = vld [vmem:[%s4367_s0 + $0x168] sm:$0xff]  ;;  %4451 = vst [vmem:[#allocation14_spill] sm:$0xff] %v2699_v12  ;;  %v2704_v13 = vld [vmem:[%s4367_s0 + $0x1e0] sm:$0xff] }
   0x7   :  { %4450 = vst [vmem:[#allocation13_spill] sm:$0xff] %v2694_v11  ;;  %4452 = vst [vmem:[#allocation15_spill] sm:$0xff] %v2704_v13  ;;  %v2717_v14 = vld [vmem:[%s4367_s0 + $0x60] sm:$0xff]  ;;  %v2727_v16 = vld [vmem:[%s4367_s0 + $0xd8] sm:$0xff] }
   0x8   :  { %2066 = vmatpush3.xpose.msk.msra.mxu0 %vm149_vm0, %v2661_v6  ;;  %v2722_v15 = vld [vmem:[%s4367_s0 + $0x160] sm:$0xff]  ;;  %v2732_v17 = vld [vmem:[%s4367_s0 + $0x1d8] sm:$0xff]  ;;  %v2755_v20 = vld [vmem:[%s4367_s0 + $0xd0] sm:$0xff] }
   0x9   :  { %2106 = vmatpush3.xpose.msk.msra.mxu1 %vm149_vm0, %v2666_v7  ;;  %2067 = vmatprep.subr.msk.mxu0 %vm149_vm0, %v2671_v8  ;;  %4453 = vst [vmem:[#allocation16_spill] sm:$0xff] %v2722_v15  ;;  %4454 = vst [vmem:[#allocation17_spill] sm:$0xff] %v2732_v17  ;;  %v2745_v18 = vld [vmem:[%s4367_s0 + $0x58] sm:$0xff]  ;;  %v2760_v21 = vld [vmem:[%s4367_s0 + $0x1d0] sm:$0xff] }
   0xa   :  { %2107 = vmatprep.subr.msk.mxu1 %vm149_vm0, %v2676_v9  ;;  %v2750_v19 = vld [vmem:[%s4367_s0 + $0x158] sm:$0xff]  ;;  %4456 = vst [vmem:[#allocation19_spill] sm:$0xff] %v2760_v21  ;;  %v2773_v22 = vld [vmem:[%s4367_s0 + $0x50] sm:$0xff]  ;;  %v2783_v24 = vld [vmem:[%s4367_s0 + $0xc8] sm:$0xff] }
   0xb   :  { %4455 = vst [vmem:[#allocation18_spill] sm:$0xff] %v2750_v19  ;;  %v2778_v23 = vld [vmem:[%s4367_s0 + $0x150] sm:$0xff]  ;;  %v2788_v25 = vld [vmem:[%s4367_s0 + $0x1c8] sm:$0xff]  ;;  %v2793_v26 = vld [vmem:[%s4368_s1] sm:$0xff] }
   0xc   :  { %2068 = vmatpush3.xpose.msk.msra.mxu0 %vm149_vm0, %v2689_v10  ;;  %4457 = vst [vmem:[#allocation20_spill] sm:$0xff] %v2778_v23  ;;  %4458 = vst [vmem:[#allocation21_spill] sm:$0xff] %v2788_v25  ;;  %v2806_v27 = vld [vmem:[%s4367_s0 + $0x48] sm:$0xff]  ;;  %v2816_v29 = vld [vmem:[%s4367_s0 + $0xc0] sm:$0xff]  ;;  %2095 = vmatprep.mubr.msk.f32.mxu0 %vm149_vm0, %v2793_v26 }
   0xd   :  { %2108 = vmatpush3.xpose.msk.msra.mxu1 %vm149_vm0, %v2694_v11  ;;  %2069 = vmatprep.subr.msk.mxu0 %vm149_vm0, %v2699_v12  ;;  %v2811_v28 = vld [vmem:[%s4367_s0 + $0x148] sm:$0xff]  ;;  %v2821_v30 = vld [vmem:[%s4367_s0 + $0x1c0] sm:$0xff]  ;;  %v2848_v33 = vld [vmem:[%s4367_s0 + $0xb8] sm:$0xff] }
   0xe   :  { %2109 = vmatprep.subr.msk.mxu1 %vm149_vm0, %v2704_v13  ;;  %4459 = vst [vmem:[#allocation22_spill] sm:$0xff] %v2811_v28  ;;  %4460 = vst [vmem:[#allocation23_spill] sm:$0xff] %v2821_v30  ;;  %2135 = vmatprep.mubr.msk.f32.mxu1 %vm149_vm0, %v2793_v26  ;;  %v2838_v31 = vld [vmem:[%s4367_s0 + $0x40] sm:$0xff]  ;;  %v2853_v34 = vld [vmem:[%s4367_s0 + $0x1b8] sm:$0xff] }
   0xf   :  { %v2843_v32 = vld [vmem:[%s4367_s0 + $0x140] sm:$0xff]  ;;  %4462 = vst [vmem:[#allocation25_spill] sm:$0xff] %v2853_v34  ;;  %v2866_v35 = vld [vmem:[%s4367_s0 + $0x38] sm:$0xff]  ;;  %v2876_v37 = vld [vmem:[%s4367_s0 + $0xb0] sm:$0xff] }
  0x10   :  { %2070 = vmatpush3.xpose.msk.msra.mxu0 %vm149_vm0, %v2717_v14  ;;  %4461 = vst [vmem:[#allocation24_spill] sm:$0xff] %v2843_v32  ;;  %v2871_v36 = vld [vmem:[%s4367_s0 + $0x138] sm:$0xff]  ;;  %v2881_v38 = vld [vmem:[%s4367_s0 + $0x1b0] sm:$0xff]  ;;  %v2904_v41 = vld [vmem:[%s4367_s0 + $0xa8] sm:$0xff] }
  0x11   :  { %2110 = vmatpush3.xpose.msk.msra.mxu1 %vm149_vm0, %v2722_v15  ;;  %2071 = vmatprep.subr.msk.mxu0 %vm149_vm0, %v2727_v16  ;;  %4463 = vst [vmem:[#allocation26_spill] sm:$0xff] %v2871_v36  ;;  %4464 = vst [vmem:[#allocation27_spill] sm:$0xff] %v2881_v38  ;;  %v2894_v39 = vld [vmem:[%s4367_s0 + $0x30] sm:$0xff]  ;;  %v2909_v42 = vld [vmem:[%s4367_s0 + $0x1a8] sm:$0xff] }
  0x12   :  { %2111 = vmatprep.subr.msk.mxu1 %vm149_vm0, %v2732_v17  ;;  %v2899_v40 = vld [vmem:[%s4367_s0 + $0x130] sm:$0xff]  ;;  %4466 = vst [vmem:[#allocation29_spill] sm:$0xff] %v2909_v42  ;;  %v2922_v43 = vld [vmem:[%s4367_s0 + $0x28] sm:$0xff]  ;;  %v2932_v45 = vld [vmem:[%s4367_s0 + $0xa0] sm:$0xff] }
  0x13   :  { %4465 = vst [vmem:[#allocation28_spill] sm:$0xff] %v2899_v40  ;;  %v2927_v44 = vld [vmem:[%s4367_s0 + $0x128] sm:$0xff]  ;;  %v2937_v46 = vld [vmem:[%s4367_s0 + $0x1a0] sm:$0xff]  ;;  %v2960_v49 = vld [vmem:[%s4367_s0 + $0x98] sm:$0xff] }
  0x14   :  { %2072 = vmatpush3.xpose.msk.msra.mxu0 %vm149_vm0, %v2745_v18  ;;  %4467 = vst [vmem:[#allocation30_spill] sm:$0xff] %v2927_v44  ;;  %4468 = vst [vmem:[#allocation31_spill] sm:$0xff] %v2937_v46  ;;  %v2950_v47 = vld [vmem:[%s4367_s0 + $0x20] sm:$0xff]  ;;  %v2965_v50 = vld [vmem:[%s4367_s0 + $0x198] sm:$0xff] }
  0x15   :  { %2112 = vmatpush3.xpose.msk.msra.mxu1 %vm149_vm0, %v2750_v19  ;;  %2073 = vmatprep.subr.msk.mxu0 %vm149_vm0, %v2755_v20  ;;  %v2955_v48 = vld [vmem:[%s4367_s0 + $0x120] sm:$0xff]  ;;  %4470 = vst [vmem:[#allocation33_spill] sm:$0xff] %v2965_v50 }
  0x16   :  { %2113 = vmatprep.subr.msk.mxu1 %vm149_vm0, %v2760_v21  ;;  %4469 = vst [vmem:[#allocation32_spill] sm:$0xff] %v2955_v48 }
  0x18   :  { %2074 = vmatpush3.xpose.msk.msra.mxu0 %vm149_vm0, %v2773_v22 }
  0x19   :  { %2114 = vmatpush3.xpose.msk.msra.mxu1 %vm149_vm0, %v2778_v23  ;;  %2075 = vmatprep.subr.msk.mxu0 %vm149_vm0, %v2783_v24 }
  0x1a   :  { %2115 = vmatprep.subr.msk.mxu1 %vm149_vm0, %v2788_v25 }
  0x1c   :  { %2076 = vmatpush3.xpose.msk.msra.mxu0 %vm149_vm0, %v2806_v27 }
  0x1d   :  { %2116 = vmatpush3.xpose.msk.msra.mxu1 %vm149_vm0, %v2811_v28  ;;  %2077 = vmatprep.subr.msk.mxu0 %vm149_vm0, %v2816_v29 }
  0x1e   :  { %2117 = vmatprep.subr.msk.mxu1 %vm149_vm0, %v2821_v30 }
  0x20   :  { %2078 = vmatpush3.xpose.msk.msra.mxu0 %vm149_vm0, %v2838_v31 }
  0x21   :  { %2118 = vmatpush3.xpose.msk.msra.mxu1 %vm149_vm0, %v2843_v32  ;;  %2079 = vmatprep.subr.msk.mxu0 %vm149_vm0, %v2848_v33 }
  0x22   :  { %2119 = vmatprep.subr.msk.mxu1 %vm149_vm0, %v2853_v34 }
  0x24   :  { %2080 = vmatpush3.xpose.msk.msra.mxu0 %vm149_vm0, %v2866_v35 }
  0x25   :  { %2120 = vmatpush3.xpose.msk.msra.mxu1 %vm149_vm0, %v2871_v36  ;;  %2081 = vmatprep.subr.msk.mxu0 %vm149_vm0, %v2876_v37 }
  0x26   :  { %2121 = vmatprep.subr.msk.mxu1 %vm149_vm0, %v2881_v38 }
  0x28   :  { %2082 = vmatpush3.xpose.msk.msra.mxu0 %vm149_vm0, %v2894_v39 }
  0x29   :  { %2122 = vmatpush3.xpose.msk.msra.mxu1 %vm149_vm0, %v2899_v40  ;;  %2083 = vmatprep.subr.msk.mxu0 %vm149_vm0, %v2904_v41 }
  0x2a   :  { %2123 = vmatprep.subr.msk.mxu1 %vm149_vm0, %v2909_v42 }
  0x2c   :  { %2084 = vmatpush3.xpose.msk.msra.mxu0 %vm149_vm0, %v2922_v43 }
  0x2d   :  { %2124 = vmatpush3.xpose.msk.msra.mxu1 %vm149_vm0, %v2927_v44  ;;  %2085 = vmatprep.subr.msk.mxu0 %vm149_vm0, %v2932_v45 }
  0x2e   :  { %2125 = vmatprep.subr.msk.mxu1 %vm149_vm0, %v2937_v46 }
  0x2f   :  { %10 = vsyncpa [#allocation3], 0  ;;  %v2978_v51 = vld [vmem:[%s4367_s0 + $0x18] sm:$0xff]  ;;  %v2988_v53 = vld [vmem:[%s4367_s0 + $0x90] sm:$0xff] }
  0x30   :  { %2086 = vmatpush3.xpose.msk.msra.mxu0 %vm149_vm0, %v2950_v47  ;;  %v2983_v52 = vld [vmem:[%s4367_s0 + $0x118] sm:$0xff]  ;;  %v2993_v54 = vld [vmem:[%s4367_s0 + $0x190] sm:$0xff]  ;;  %v3016_v57 = vld [vmem:[%s4367_s0 + $0x88] sm:$0xff] }
  0x31   :  { %2126 = vmatpush3.xpose.msk.msra.mxu1 %vm149_vm0, %v2955_v48  ;;  %2087 = vmatprep.subr.msk.mxu0 %vm149_vm0, %v2960_v49  ;;  %4471 = vst [vmem:[#allocation34_spill] sm:$0xff] %v2983_v52  ;;  %4472 = vst [vmem:[#allocation35_spill] sm:$0xff] %v2993_v54  ;;  %v3006_v55 = vld [vmem:[%s4367_s0 + $0x10] sm:$0xff]  ;;  %v3021_v58 = vld [vmem:[%s4367_s0 + $0x188] sm:$0xff] }
  0x32   :  { %2127 = vmatprep.subr.msk.mxu1 %vm149_vm0, %v2965_v50  ;;  %v3011_v56 = vld [vmem:[%s4367_s0 + $0x110] sm:$0xff]  ;;  %4474 = vst [vmem:[#allocation37_spill] sm:$0xff] %v3021_v58  ;;  %v3034_v59 = vld [vmem:[%s4367_s0 + $0x8] sm:$0xff]  ;;  %v3044_v61 = vld [vmem:[%s4367_s0 + $0x80] sm:$0xff] }
  0x33   :  { %4473 = vst [vmem:[#allocation36_spill] sm:$0xff] %v3011_v56  ;;  %v3039_v60 = vld [vmem:[%s4367_s0 + $0x108] sm:$0xff]  ;;  %v3049_v62 = vld [vmem:[%s4367_s0 + $0x180] sm:$0xff]  ;;  %v3072_v5 = vld [vmem:[%s4367_s0 + $0x2f8] sm:$0xff] }
  0x34   :  { %2088 = vmatpush3.xpose.msk.msra.mxu0 %vm149_vm0, %v2978_v51  ;;  %4475 = vst [vmem:[#allocation38_spill] sm:$0xff] %v3039_v60  ;;  %4476 = vst [vmem:[#allocation39_spill] sm:$0xff] %v3049_v62  ;;  %v3062_v63 = vld [vmem:[%s4367_s0] sm:$0xff]  ;;  %v3077_v9 = vld [vmem:[%s4367_s0 + $0x3f8] sm:$0xff] }
  0x35   :  { %2128 = vmatpush3.xpose.msk.msra.mxu1 %vm149_vm0, %v2983_v52  ;;  %2089 = vmatprep.subr.msk.mxu0 %vm149_vm0, %v2988_v53  ;;  %v3067_v1 = vld [vmem:[%s4367_s0 + $0x100] sm:$0xff]  ;;  %4478 = vst [vmem:[#allocation41_spill] sm:$0xff] %v3072_v5  ;;  %4479 = vst [vmem:[#allocation42_spill] sm:$0xff] %v3077_v9  ;;  %v3090_v13 = vld [vmem:[%s4367_s0 + $0x278] sm:$0xff] }
  0x36   :  { %2129 = vmatprep.subr.msk.mxu1 %vm149_vm0, %v2993_v54  ;;  %4477 = vst [vmem:[#allocation40_spill] sm:$0xff] %v3067_v1  ;;  %v3095_v17 = vld [vmem:[%s4367_s0 + $0x378] sm:$0xff]  ;;  %v3100_v21 = vld [vmem:[%s4367_s0 + $0x2f0] sm:$0xff]  ;;  %v3137_v38 = vld [vmem:[%s4367_s0 + $0x2e8] sm:$0xff] }
  0x37   :  { %4480 = vst [vmem:[#allocation43_spill] sm:$0xff] %v3095_v17  ;;  %4481 = vst [vmem:[#allocation44_spill] sm:$0xff] %v3100_v21  ;;  %v3105_v25 = vld [vmem:[%s4367_s0 + $0x3f0] sm:$0xff]  ;;  %v3142_v42 = vld [vmem:[%s4367_s0 + $0x3e8] sm:$0xff] }
  0x38   :  { %2090 = vmatpush3.xpose.msk.msra.mxu0 %vm149_vm0, %v3006_v55  ;;  %4482 = vst [vmem:[#allocation45_spill] sm:$0xff] %v3105_v25  ;;  %v3127_v30 = vld [vmem:[%s4367_s0 + $0x270] sm:$0xff]  ;;  %4484 = vst [vmem:[#allocation47_spill] sm:$0xff] %v3137_v38  ;;  %v3168_v46 = vld [vmem:[%s4367_s0 + $0x268] sm:$0xff] }
  0x39   :  { %2130 = vmatpush3.xpose.msk.msra.mxu1 %vm149_vm0, %v3011_v56  ;;  %2091 = vmatprep.subr.msk.mxu0 %vm149_vm0, %v3016_v57  ;;  %v3132_v34 = vld [vmem:[%s4367_s0 + $0x370] sm:$0xff]  ;;  %4485 = vst [vmem:[#allocation48_spill] sm:$0xff] %v3142_v42  ;;  %v3173_v50 = vld [vmem:[%s4367_s0 + $0x368] sm:$0xff]  ;;  %v3178_v54 = vld [vmem:[%s4367_s0 + $0x2e0] sm:$0xff] }
  0x3a   :  { %2131 = vmatprep.subr.msk.mxu1 %vm149_vm0, %v3021_v58  ;;  %4483 = vst [vmem:[#allocation46_spill] sm:$0xff] %v3132_v34  ;;  %4486 = vst [vmem:[#allocation49_spill] sm:$0xff] %v3173_v50  ;;  %v3183_v58 = vld [vmem:[%s4367_s0 + $0x3e0] sm:$0xff]  ;;  %v3219_v3 = vld [vmem:[%s4367_s0 + $0x2d8] sm:$0xff] }
  0x3b   :  { %4487 = vst [vmem:[#allocation50_spill] sm:$0xff] %v3178_v54  ;;  %4488 = vst [vmem:[#allocation51_spill] sm:$0xff] %v3183_v58  ;;  %v3250_v7 = vld [vmem:[%s4367_s0 + $0x358] sm:$0xff]  ;;  %v3260_v11 = vld [vmem:[%s4367_s0 + $0x3d0] sm:$0xff] }
  0x3c   :  { %2092 = vmatpush3.xpose.msk.msra.mxu0 %vm149_vm0, %v3034_v59  ;;  %4491 = vst [vmem:[#allocation54_spill] sm:$0xff] %v3250_v7  ;;  %4492 = vst [vmem:[#allocation55_spill] sm:$0xff] %v3260_v11  ;;  %v3287_v15 = vld [vmem:[%s4367_s0 + $0x2c8] sm:$0xff]  ;;  %v3320_v23 = vld [vmem:[%s4367_s0 + $0x3c0] sm:$0xff] }
  0x3d   :  { %2132 = vmatpush3.xpose.msk.msra.mxu1 %vm149_vm0, %v3039_v60  ;;  %2093 = vmatprep.subr.msk.mxu0 %vm149_vm0, %v3044_v61  ;;  %v3310_v19 = vld [vmem:[%s4367_s0 + $0x348] sm:$0xff]  ;;  %4496 = vst [vmem:[#allocation59_spill] sm:$0xff] %v3320_v23  ;;  %v3338_v28 = vld [vmem:[%s4367_s0 + $0x340] sm:$0xff]  ;;  %v3348_v32 = vld [vmem:[%s4367_s0 + $0x3b8] sm:$0xff] }
  0x3e   :  { %2133 = vmatprep.subr.msk.mxu1 %vm149_vm0, %v3049_v62  ;;  %v3209_v62 = vld [vmem:[%s4367_s0 + $0x260] sm:$0xff]  ;;  %4495 = vst [vmem:[#allocation58_spill] sm:$0xff] %v3310_v19  ;;  %4497 = vst [vmem:[#allocation60_spill] sm:$0xff] %v3338_v28  ;;  %v3366_v36 = vld [vmem:[%s4367_s0 + $0x338] sm:$0xff] }
  0x3f   :  { %4498 = vst [vmem:[#allocation61_spill] sm:$0xff] %v3348_v32  ;;  %4499 = vst [vmem:[#allocation62_spill] sm:$0xff] %v3366_v36  ;;  %v3376_v40 = vld [vmem:[%s4367_s0 + $0x3b0] sm:$0xff]  ;;  %v3404_v48 = vld [vmem:[%s4367_s0 + $0x3a8] sm:$0xff] }
  0x40   :  { %2094 = vmatpush3.xpose.msk.msra.mxu0 %vm149_vm0, %v3062_v63  ;;  %4500 = vst [vmem:[#allocation63_spill] sm:$0xff] %v3376_v40  ;;  %v3394_v44 = vld [vmem:[%s4367_s0 + $0x330] sm:$0xff]  ;;  %4502 = vst [vmem:[#allocation65_spill] sm:$0xff] %v3404_v48  ;;  %v3422_v52 = vld [vmem:[%s4367_s0 + $0x328] sm:$0xff] }
  0x41   :  { %2134 = vmatpush3.xpose.msk.msra.mxu1 %vm149_vm0, %v3067_v1  ;;  %2143 = vmatprep.subr.msk.mxu0 %vm149_vm0, %v3072_v5  ;;  %4501 = vst [vmem:[#allocation64_spill] sm:$0xff] %v3394_v44  ;;  %4503 = vst [vmem:[#allocation66_spill] sm:$0xff] %v3422_v52  ;;  %v3432_v56 = vld [vmem:[%s4367_s0 + $0x3a0] sm:$0xff]  ;;  %v3460_v1 = vld [vmem:[%s4367_s0 + $0x398] sm:$0xff] }
  0x42   :  { %2183 = vmatprep.subr.msk.mxu1 %vm149_vm0, %v3077_v9  ;;  %v3114_v9 = vld [vmem:[%s4368_s1 + $0x8] sm:$0xff]  ;;  %4504 = vst [vmem:[#allocation67_spill] sm:$0xff] %v3432_v56  ;;  %v3450_v60 = vld [vmem:[%s4367_s0 + $0x320] sm:$0xff]  ;;  %4506 = vst [vmem:[#allocation69_spill] sm:$0xff] %v3460_v1 }
  0x43   :  { %2096 = vmatmul.mubr.msk.f32.vlgmr.msra.gmra.mxu0 %vm149_vm0, %v2793_v26  ;;  %4505 = vst [vmem:[#allocation68_spill] sm:$0xff] %v3450_v60  ;;  %v3478_v5 = vld [vmem:[%s4367_s0 + $0x318] sm:$0xff]  ;;  %v3488_v0 = vld [vmem:[%s4367_s0 + $0x390] sm:$0xff]  ;;  %v3509_v4 = vld [vmem:[%s4367_s0 + $0x288] sm:$0xff] }
  0x44   :  { %2136 = vmatmul.mubr.msk.f32.vlgmr.msra.gmra.mxu1 %vm149_vm0, %v2793_v26  ;;  %2144 = vmatpush3.xpose.msk.msra.mxu0 %vm149_vm0, %v3090_v13  ;;  %4507 = vst [vmem:[#allocation70_spill] sm:$0xff] %v3478_v5  ;;  %4508 = vst [vmem:[#allocation71_spill] sm:$0xff] %v3488_v0  ;;  %v3534_v8 = vld [vmem:[%s4367_s0 + $0x280] sm:$0xff]  ;;  %v937_v12 = vld [vmem:[%s4369_s2 + $0x18] sm:$0xff] }
  0x45   :  { %2184 = vmatpush3.xpose.msk.msra.mxu1 %vm149_vm0, %v3095_v17  ;;  %2145 = vmatprep.subr.msk.mxu0 %vm149_vm0, %v3100_v21  ;;  %v3214_v17 = vld [vmem:[%s4367_s0 + $0x360] sm:$0xff]  ;;  %v3504_v21 = vld [vmem:[%s4367_s0 + $0x310] sm:$0xff] }
  0x46   :  { %2185 = vmatprep.subr.msk.mxu1 %vm149_vm0, %v3105_v25  ;;  %2097 = vmatprep.mubr.msk.f32.mxu0 %vm149_vm0, %v3114_v9  ;;  %v3155_v25 = vld [vmem:[%s4368_s1 + $0x10] sm:$0xff]  ;;  %4489 = vst [vmem:[#allocation52_spill] sm:$0xff] %v3214_v17  ;;  %4509 = vst [vmem:[#allocation72_spill] sm:$0xff] %v3504_v21 }
  0x47   :  { %2137 = vmatprep.mubr.msk.f32.mxu1 %vm149_vm0, %v3114_v9  ;;  %2098 = vmatmul.mubr.msk.f32.gmra.mxu0 %vm149_vm0, %v3114_v9 }
  0x48   :  { %2138 = vmatmul.mubr.msk.f32.gmra.mxu1 %vm149_vm0, %v3114_v9  ;;  %2146 = vmatpush3.xpose.msk.msra.mxu0 %vm149_vm0, %v3127_v30 }
  0x49   :  { %2186 = vmatpush3.xpose.msk.msra.mxu1 %vm149_vm0, %v3132_v34  ;;  %2147 = vmatprep.subr.msk.mxu0 %vm149_vm0, %v3137_v38  ;;  %v3224_v34 = vld [vmem:[%s4367_s0 + $0x3d8] sm:$0xff]  ;;  %v3529_v38 = vld [vmem:[%s4367_s0 + $0x308] sm:$0xff] }
  0x4a   :  { %2187 = vmatprep.subr.msk.mxu1 %vm149_vm0, %v3142_v42  ;;  %2099 = vmatprep.mubr.msk.f32.mxu0 %vm149_vm0, %v3155_v25  ;;  %v3196_v42 = vld [vmem:[%s4368_s1 + $0x18] sm:$0xff]  ;;  %4490 = vst [vmem:[#allocation53_spill] sm:$0xff] %v3224_v34 }
  0x4b   :  { %2139 = vmatprep.mubr.msk.f32.mxu1 %vm149_vm0, %v3155_v25  ;;  %2100 = vmatmul.mubr.msk.f32.gmra.mxu0 %vm149_vm0, %v3155_v25 }
  0x4c   :  { %2140 = vmatmul.mubr.msk.f32.gmra.mxu1 %vm149_vm0, %v3155_v25  ;;  %2148 = vmatpush3.xpose.msk.msra.mxu0 %vm149_vm0, %v3168_v46 }
  0x4d   :  { %2188 = vmatpush3.xpose.msk.msra.mxu1 %vm149_vm0, %v3173_v50  ;;  %2149 = vmatprep.subr.msk.mxu0 %vm149_vm0, %v3178_v54  ;;  %v3255_v50 = vld [vmem:[%s4367_s0 + $0x2d0] sm:$0xff]  ;;  %v3554_v54 = vld [vmem:[%s4367_s0 + $0x300] sm:$0xff] }
  0x4e   :  { %2189 = vmatprep.subr.msk.mxu1 %vm149_vm0, %v3183_v58  ;;  %2101 = vmatprep.mubr.msk.f32.mxu0 %vm149_vm0, %v3196_v42  ;;  %v3245_v58 = vld [vmem:[%s4367_s0 + $0x258] sm:$0xff] }
  0x4f   :  { %2141 = vmatprep.mubr.msk.f32.mxu1 %vm149_vm0, %v3196_v42  ;;  %2102 = vmatmul.mubr.msk.f32.gmra.mxu0 %vm149_vm0, %v3196_v42 }
  0x50   :  { %2142 = vmatmul.mubr.msk.f32.gmra.mxu1 %vm149_vm0, %v3196_v42  ;;  %2150 = vmatpush3.xpose.msk.msra.mxu0 %vm149_vm0, %v3209_v62 }
  0x51   :  { %2190 = vmatpush3.xpose.msk.msra.mxu1 %vm149_vm0, %v3214_v17  ;;  %2151 = vmatprep.subr.msk.mxu0 %vm149_vm0, %v3219_v3  ;;  %v3282_v17 = vld [vmem:[%s4367_s0 + $0x350] sm:$0xff] }
  0x52   :  { %2191 = vmatprep.subr.msk.mxu1 %vm149_vm0, %v3224_v34  ;;  %2175 = vmatprep.mubr.msk.f32.mxu0 %vm149_vm0, %v2793_v26  ;;  %v3277_v34 = vld [vmem:[%s4367_s0 + $0x250] sm:$0xff]  ;;  %4493 = vst [vmem:[#allocation56_spill] sm:$0xff] %v3282_v17 }
  0x53   :  { %2215 = vmatprep.mubr.msk.f32.mxu1 %vm149_vm0, %v2793_v26 }
  0x54   :  { %2152 = vmatpush3.xpose.msk.msra.mxu0 %vm149_vm0, %v3245_v58 }
  0x55   :  { %2192 = vmatpush3.xpose.msk.msra.mxu1 %vm149_vm0, %v3250_v7  ;;  %2153 = vmatprep.subr.msk.mxu0 %vm149_vm0, %v3255_v50  ;;  %v3292_v7 = vld [vmem:[%s4367_s0 + $0x3c8] sm:$0xff] }
  0x56   :  { %2193 = vmatprep.subr.msk.mxu1 %vm149_vm0, %v3260_v11  ;;  %4494 = vst [vmem:[#allocation57_spill] sm:$0xff] %v3292_v7  ;;  %v3305_v11 = vld [vmem:[%s4367_s0 + $0x248] sm:$0xff] }
  0x58   :  { %2154 = vmatpush3.xpose.msk.msra.mxu0 %vm149_vm0, %v3277_v34 }
  0x59   :  { %2194 = vmatpush3.xpose.msk.msra.mxu1 %vm149_vm0, %v3282_v17  ;;  %2155 = vmatprep.subr.msk.mxu0 %vm149_vm0, %v3287_v15  ;;  %v3315_v17 = vld [vmem:[%s4367_s0 + $0x2c0] sm:$0xff] }
  0x5a   :  { %2195 = vmatprep.subr.msk.mxu1 %vm149_vm0, %v3292_v7  ;;  %v3333_v7 = vld [vmem:[%s4367_s0 + $0x240] sm:$0xff] }
  0x5c   :  { %2156 = vmatpush3.xpose.msk.msra.mxu0 %vm149_vm0, %v3305_v11 }
  0x5d   :  { %2196 = vmatpush3.xpose.msk.msra.mxu1 %vm149_vm0, %v3310_v19  ;;  %2157 = vmatprep.subr.msk.mxu0 %vm149_vm0, %v3315_v17  ;;  %v3343_v19 = vld [vmem:[%s4367_s0 + $0x2b8] sm:$0xff] }
  0x5e   :  { %2197 = vmatprep.subr.msk.mxu1 %vm149_vm0, %v3320_v23  ;;  %v3361_v23 = vld [vmem:[%s4367_s0 + $0x238] sm:$0xff] }
  0x60   :  { %2158 = vmatpush3.xpose.msk.msra.mxu0 %vm149_vm0, %v3333_v7 }
  0x61   :  { %2198 = vmatpush3.xpose.msk.msra.mxu1 %vm149_vm0, %v3338_v28  ;;  %2159 = vmatprep.subr.msk.mxu0 %vm149_vm0, %v3343_v19  ;;  %v3371_v28 = vld [vmem:[%s4367_s0 + $0x2b0] sm:$0xff] }
  0x62   :  { %2199 = vmatprep.subr.msk.mxu1 %vm149_vm0, %v3348_v32  ;;  %v3389_v32 = vld [vmem:[%s4367_s0 + $0x230] sm:$0xff] }
  0x64   :  { %2160 = vmatpush3.xpose.msk.msra.mxu0 %vm149_vm0, %v3361_v23 }
  0x65   :  { %2200 = vmatpush3.xpose.msk.msra.mxu1 %vm149_vm0, %v3366_v36  ;;  %2161 = vmatprep.subr.msk.mxu0 %vm149_vm0, %v3371_v28  ;;  %v3399_v36 = vld [vmem:[%s4367_s0 + $0x2a8] sm:$0xff] }
  0x66   :  { %2201 = vmatprep.subr.msk.mxu1 %vm149_vm0, %v3376_v40  ;;  %v3417_v40 = vld [vmem:[%s4367_s0 + $0x228] sm:$0xff] }
  0x68   :  { %2162 = vmatpush3.xpose.msk.msra.mxu0 %vm149_vm0, %v3389_v32 }
  0x69   :  { %2202 = vmatpush3.xpose.msk.msra.mxu1 %vm149_vm0, %v3394_v44  ;;  %2163 = vmatprep.subr.msk.mxu0 %vm149_vm0, %v3399_v36  ;;  %v3427_v44 = vld [vmem:[%s4367_s0 + $0x2a0] sm:$0xff] }
  0x6a   :  { %2203 = vmatprep.subr.msk.mxu1 %vm149_vm0, %v3404_v48  ;;  %v3445_v48 = vld [vmem:[%s4367_s0 + $0x220] sm:$0xff] }
  0x6c   :  { %2164 = vmatpush3.xpose.msk.msra.mxu0 %vm149_vm0, %v3417_v40 }
  0x6d   :  { %2204 = vmatpush3.xpose.msk.msra.mxu1 %vm149_vm0, %v3422_v52  ;;  %2165 = vmatprep.subr.msk.mxu0 %vm149_vm0, %v3427_v44  ;;  %v3455_v52 = vld [vmem:[%s4367_s0 + $0x298] sm:$0xff] }
  0x6e   :  { %2205 = vmatprep.subr.msk.mxu1 %vm149_vm0, %v3432_v56  ;;  %v3473_v56 = vld [vmem:[%s4367_s0 + $0x218] sm:$0xff] }
  0x70   :  { %2166 = vmatpush3.xpose.msk.msra.mxu0 %vm149_vm0, %v3445_v48 }
  0x71   :  { %2206 = vmatpush3.xpose.msk.msra.mxu1 %vm149_vm0, %v3450_v60  ;;  %2167 = vmatprep.subr.msk.mxu0 %vm149_vm0, %v3455_v52  ;;  %v3483_v60 = vld [vmem:[%s4367_s0 + $0x290] sm:$0xff] }
  0x72   :  { %2207 = vmatprep.subr.msk.mxu1 %vm149_vm0, %v3460_v1  ;;  %v83_v1 = vld [vmem:[%s4367_s0 + $0x210] sm:$0xff] }
  0x74   :  { %2168 = vmatpush3.xpose.msk.msra.mxu0 %vm149_vm0, %v3473_v56 }
  0x75   :  { %2208 = vmatpush3.xpose.msk.msra.mxu1 %vm149_vm0, %v3478_v5  ;;  %2169 = vmatprep.subr.msk.mxu0 %vm149_vm0, %v3483_v60  ;;  %v3514_v5 = vld [vmem:[%s4367_s0 + $0x388] sm:$0xff] }
  0x76   :  { %2209 = vmatprep.subr.msk.mxu1 %vm149_vm0, %v3488_v0  ;;  %4510 = vst [vmem:[#allocation73_spill] sm:$0xff] %v3514_v5  ;;  %v82_v0 = vld [vmem:[%s4367_s0 + $0x208] sm:$0xff] }
  0x78   :  { %2170 = vmatpush3.xpose.msk.msra.mxu0 %vm149_vm0, %v83_v1 }
  0x79   :  { %2210 = vmatpush3.xpose.msk.msra.mxu1 %vm149_vm0, %v3504_v21  ;;  %2171 = vmatprep.subr.msk.mxu0 %vm149_vm0, %v3509_v4  ;;  %v3539_v21 = vld [vmem:[%s4367_s0 + $0x380] sm:$0xff] }
  0x7a   :  { %2211 = vmatprep.subr.msk.mxu1 %vm149_vm0, %v3514_v5  ;;  %4511 = vst [vmem:[#allocation74_spill] sm:$0xff] %v3539_v21  ;;  %v81_v5 = vld [vmem:[%s4367_s0 + $0x200] sm:$0xff] }
  0x7c   :  { %2172 = vmatpush3.xpose.msk.msra.mxu0 %vm149_vm0, %v82_v0 }
  0x7d   :  { %2212 = vmatpush3.xpose.msk.msra.mxu1 %vm149_vm0, %v3529_v38  ;;  %2173 = vmatprep.subr.msk.mxu0 %vm149_vm0, %v3534_v8 }
  0x7e   :  { %2213 = vmatprep.subr.msk.mxu1 %vm149_vm0, %v3539_v21  ;;  %v936_v21 = vld [vmem:[%s4369_s2 + $0x10] sm:$0xff] }
  0x80   :  { %2174 = vmatpush3.xpose.msk.msra.mxu0 %vm149_vm0, %v81_v5 }
  0x81   :  { %2214 = vmatpush3.xpose.msk.msra.mxu1 %vm149_vm0, %v3554_v54  ;;  %2355 = vmatprep.subr.mxu0 %v937_v12 }
  0x82   :  { %2555 = vmatprep.subr.mxu1 %v937_v12 }
  0x83   :  { %2176 = vmatmul.mubr.msk.f32.vlgmr.msra.gmra.mxu0 %vm149_vm0, %v2793_v26 }
  0x84   :  { %2216 = vmatmul.mubr.msk.f32.vlgmr.msra.gmra.mxu1 %vm149_vm0, %v2793_v26  ;;  %2356 = vmatpush3.msra.mxu0 %v937_v12  ;;  %v935_v26 = vld [vmem:[%s4369_s2 + $0x8] sm:$0xff] }
  0x85   :  { %2559 = vmatpush3.msra.mxu1 %v937_v12  ;;  %2177 = vmatprep.mubr.msk.f32.mxu0 %vm149_vm0, %v3114_v9  ;;  %v4523_v12 = vld [vmem:[#allocation72_spill] sm:$0xff] }
  0x86   :  { %2217 = vmatprep.mubr.msk.f32.mxu1 %vm149_vm0, %v3114_v9  ;;  %2357 = vmatprep.subr.mxu0 %v936_v21 }
  0x87   :  { %2556 = vmatprep.subr.mxu1 %v936_v21  ;;  %2178 = vmatmul.mubr.msk.f32.gmra.mxu0 %vm149_vm0, %v3114_v9 }
  0x88   :  { %2218 = vmatmul.mubr.msk.f32.gmra.mxu1 %vm149_vm0, %v3114_v9  ;;  %2358 = vmatpush3.msra.mxu0 %v936_v21  ;;  %v934_v9 = vld [vmem:[%s4369_s2] sm:$0xff]  ;;  %s2588_s2 = smov [#allocation2]  }
  0x89   :  { %2560 = vmatpush3.msra.mxu1 %v936_v21  ;;  %2179 = vmatprep.mubr.msk.f32.mxu0 %vm149_vm0, %v3155_v25  ;;  %v4532_v21 = vld [vmem:[#allocation26_spill] sm:$0xff]  ;;  %s1776_s22 = sshll.u32 %s2588_s2, 4  ;;  %s1777_s22 = int_to_ptr.vmem [resolvable:$true] %s1776_s22 }
  0x8a   :  { %2219 = vmatprep.mubr.msk.f32.mxu1 %vm149_vm0, %v3155_v25  ;;  %2359 = vmatprep.subr.mxu0 %v935_v26  ;;  %s2566_s23 = scalar_lea.vmem %s1777_s22, 4096  ;;  %p2571_p1 = scmp.lt.s32.totalorder %s1777_s22, %s1777_s22 }
  0x8b   :  { %2557 = vmatprep.subr.mxu1 %v935_v26  ;;  %2180 = vmatmul.mubr.msk.f32.gmra.mxu0 %vm149_vm0, %v3155_v25  ;;  %p2567_p0 = scmp.ne.s32.totalorder %s1777_s22, %s2566_s23  ;;  %p2572_p2 = scmp.lt.s32.totalorder %s2566_s23, %s2566_s23 }
  0x8c   :  { %2220 = vmatmul.mubr.msk.f32.gmra.mxu1 %vm149_vm0, %v3155_v25  ;;  %2360 = vmatpush3.msra.mxu0 %v935_v26  ;;  %v4536_v25 = vld [vmem:[#allocation22_spill] sm:$0xff] }
  0x8d   :  { %2561 = vmatpush3.msra.mxu1 %v935_v26  ;;  %2181 = vmatprep.mubr.msk.f32.mxu0 %vm149_vm0, %v3196_v42  ;;  %p2573_p3 = por %p2572_p2, %p2571_p1 }
  0x8e   :  { %2221 = vmatprep.mubr.msk.f32.mxu1 %vm149_vm0, %v3196_v42  ;;  %2361 = vmatprep.subr.mxu0 %v934_v9 }
  0x8f   :  { %2558 = vmatprep.subr.mxu1 %v934_v9  ;;  %2182 = vmatmul.mubr.msk.f32.gmra.mxu0 %vm149_vm0, %v3196_v42  ;;  %p2574_p4 = pnand %p2573_p3, %p2567_p0 }
  0x90   :  { %2222 = vmatmul.mubr.msk.f32.gmra.mxu1 %vm149_vm0, %v3196_v42  ;;  %2362 = vmatpush3.msra.mxu0 %v934_v9  ;;  %v4552_v42 = vld [vmem:[#allocation37_spill] sm:$0xff] }
  0x91   :  { %2562 = vmatpush3.msra.mxu1 %v934_v9  ;;  %2363 = vmatprep.mubr.msk.f32.mxu0 %vm149_vm0, %v3062_v63  ;;  %v4571_v63 = vld [vmem:[#allocation55_spill] sm:$0xff] }
  0x92   :  { %2459 = vmatprep.mubr.msk.f32.mxu1 %vm149_vm0, %v81_v5  ;;  %v4516_v5 = vld [vmem:[#allocation8_spill] sm:$0xff] }
  0x93   :  { %2364 = vmatmul.mubr.msk.f32.vlgmr.msra.gmra.mxu0 %vm149_vm0, %v3034_v59 }
  0x94   :  { %2460 = vmatmul.mubr.msk.f32.vlgmr.msra.gmra.mxu1 %vm149_vm0, %v82_v0  ;;  %2366 = vmatprep.mubr.msk.f32.mxu0 %vm149_vm0, %v3006_v55  ;;  %v4512_v0 = vld [vmem:[#allocation14_spill] sm:$0xff]  ;;  %v4565_v55 = vld [vmem:[#allocation61_spill] sm:$0xff] }
  0x95   :  { %2462 = vmatprep.mubr.msk.f32.mxu1 %vm149_vm0, %v83_v1  ;;  %v4513_v1 = vld [vmem:[#allocation50_spill] sm:$0xff] }
  0x97   :  { %2367 = vmatmul.mubr.msk.f32.gmra.mxu0 %vm149_vm0, %v2978_v51  ;;  %v4561_v51 = vld [vmem:[#allocation65_spill] sm:$0xff] }
  0x98   :  { %2463 = vmatmul.mubr.msk.f32.gmra.mxu1 %vm149_vm0, %v3473_v56  ;;  %2369 = vmatprep.mubr.msk.f32.mxu0 %vm149_vm0, %v2950_v47  ;;  %v4557_v47 = vld [vmem:[#allocation69_spill] sm:$0xff]  ;;  %v4566_v56 = vld [vmem:[#allocation23_spill] sm:$0xff] }
  0x99   :  { %2465 = vmatprep.mubr.msk.f32.mxu1 %vm149_vm0, %v3445_v48  ;;  %v4558_v48 = vld [vmem:[#allocation31_spill] sm:$0xff] }
  0x9b   :  { %2370 = vmatmul.mubr.msk.f32.gmra.mxu0 %vm149_vm0, %v2922_v43  ;;  %v4553_v43 = vld [vmem:[#allocation73_spill] sm:$0xff] }
  0x9c   :  { %2466 = vmatmul.mubr.msk.f32.gmra.mxu1 %vm149_vm0, %v3417_v40  ;;  %2372 = vmatprep.mubr.msk.f32.mxu0 %vm149_vm0, %v2894_v39  ;;  %v4549_v39 = vld [vmem:[#allocation43_spill] sm:$0xff] }
  0x9d   :  { %2468 = vmatprep.mubr.msk.f32.mxu1 %vm149_vm0, %v3389_v32  ;;  %v4542_v32 = vld [vmem:[#allocation16_spill] sm:$0xff]  ;;  %v4550_v40 = vld [vmem:[#allocation39_spill] sm:$0xff] }
  0x9f   :  { %2373 = vmatmul.mubr.msk.f32.gmra.mxu0 %vm149_vm0, %v2866_v35  ;;  %v4545_v35 = vld [vmem:[#allocation49_spill] sm:$0xff] }
  0xa0   :  { %2469 = vmatmul.mubr.msk.f32.gmra.mxu1 %vm149_vm0, %v3361_v23  ;;  %2375 = vmatprep.mubr.msk.f32.mxu0 %vm149_vm0, %v2838_v31  ;;  %v4534_v23 = vld [vmem:[#allocation24_spill] sm:$0xff]  ;;  %v4541_v31 = vld [vmem:[#allocation54_spill] sm:$0xff] }
  0xa1   :  { %2471 = vmatprep.mubr.msk.f32.mxu1 %vm149_vm0, %v3333_v7  ;;  %v4518_v7 = vld [vmem:[#allocation5_spill] sm:$0xff] }
  0xa3   :  { %2376 = vmatmul.mubr.msk.f32.gmra.mxu0 %vm149_vm0, %v2806_v27  ;;  %v4537_v27 = vld [vmem:[#allocation58_spill] sm:$0xff] }
  0xa4   :  { %2472 = vmatmul.mubr.msk.f32.gmra.mxu1 %vm149_vm0, %v3305_v11  ;;  %2378 = vmatprep.mubr.msk.f32.mxu0 %vm149_vm0, %v2773_v22  ;;  %v4522_v11 = vld [vmem:[#allocation36_spill] sm:$0xff]  ;;  %v4533_v22 = vld [vmem:[#allocation62_spill] sm:$0xff] }
  0xa5   :  { %2474 = vmatprep.mubr.msk.f32.mxu1 %vm149_vm0, %v3277_v34  ;;  %v4544_v34 = vld [vmem:[#allocation13_spill] sm:$0xff] }
  0xa7   :  { %2379 = vmatmul.mubr.msk.f32.gmra.mxu0 %vm149_vm0, %v2745_v18  ;;  %v4529_v18 = vld [vmem:[#allocation66_spill] sm:$0xff] }
  0xa8   :  { %2475 = vmatmul.mubr.msk.f32.gmra.mxu1 %vm149_vm0, %v3245_v58  ;;  %2381 = vmatprep.mubr.msk.f32.mxu0 %vm149_vm0, %v2717_v14  ;;  %v4525_v14 = vld [vmem:[#allocation70_spill] sm:$0xff] }
  0xa9   :  { %2477 = vmatprep.mubr.msk.f32.mxu1 %vm149_vm0, %v3209_v62  ;;  %v4570_v62 = vld [vmem:[#allocation19_spill] sm:$0xff] }
  0xab   :  { %2382 = vmatmul.mubr.msk.f32.gmra.mxu0 %vm149_vm0, %v2689_v10  ;;  %v4521_v10 = vld [vmem:[#allocation38_spill] sm:$0xff] }
  0xac   :  { %2478 = vmatmul.mubr.msk.f32.gmra.mxu1 %vm149_vm0, %v3168_v46  ;;  %2384 = vmatprep.mubr.msk.f32.mxu0 %vm149_vm0, %v2661_v6  ;;  %v4517_v6 = vld [vmem:[#allocation44_spill] sm:$0xff]  ;;  %v4556_v46 = vld [vmem:[#allocation33_spill] sm:$0xff] }
  0xad   :  { %2480 = vmatprep.mubr.msk.f32.mxu1 %vm149_vm0, %v3127_v30  ;;  %v4540_v30 = vld [vmem:[#allocation18_spill] sm:$0xff] }
  0xaf   :  { %2385 = vmatmul.mubr.msk.f32.gmra.mxu0 %vm149_vm0, %v2629_v2  ;;  %v4514_v2 = vld [vmem:[#allocation11_spill] sm:$0xff] }
  0xb0   :  { %2481 = vmatmul.mubr.msk.f32.gmra.mxu1 %vm149_vm0, %v3090_v13  ;;  %2387 = vmatprep.mubr.msk.f32.mxu0 %vm149_vm0, %v3044_v61  ;;  %v4524_v13 = vld [vmem:[#allocation34_spill] sm:$0xff]  ;;  %v4569_v61 = vld [vmem:[#allocation57_spill] sm:$0xff] }
  0xb1   :  { %2483 = vmatprep.mubr.msk.f32.mxu1 %vm149_vm0, %v3534_v8  ;;  %v4520_v8 = vld [vmem:[#allocation40_spill] sm:$0xff] }
  0xb3   :  { %2388 = vmatmul.mubr.msk.f32.gmra.mxu0 %vm149_vm0, %v3016_v57  ;;  %v4567_v57 = vld [vmem:[#allocation59_spill] sm:$0xff] }
  0xb4   :  { %2484 = vmatmul.mubr.msk.f32.gmra.mxu1 %vm149_vm0, %v3509_v4  ;;  %2390 = vmatprep.mubr.msk.f32.mxu0 %vm149_vm0, %v2988_v53  ;;  %v4515_v4 = vld [vmem:[#allocation47_spill] sm:$0xff] }
  0xb5   :  { %2486 = vmatprep.mubr.msk.f32.mxu1 %vm149_vm0, %v3483_v60  ;;  %v4563_v53 = vld [vmem:[#allocation63_spill] sm:$0xff]  ;;  %v4568_v60 = vld [vmem:[#allocation21_spill] sm:$0xff] }
  0xb7   :  { %2391 = vmatmul.mubr.msk.f32.gmra.mxu0 %vm149_vm0, %v2960_v49  ;;  %v4559_v49 = vld [vmem:[#allocation67_spill] sm:$0xff] }
  0xb8   :  { %2487 = vmatmul.mubr.msk.f32.gmra.mxu1 %vm149_vm0, %v3455_v52  ;;  %2393 = vmatprep.mubr.msk.f32.mxu0 %vm149_vm0, %v2932_v45  ;;  %v4555_v45 = vld [vmem:[#allocation71_spill] sm:$0xff] }
  0xb9   :  { %2489 = vmatprep.mubr.msk.f32.mxu1 %vm149_vm0, %v3427_v44  ;;  %v4554_v44 = vld [vmem:[#allocation35_spill] sm:$0xff] }
  0xba   :  { %v4562_v52 = vld [vmem:[#allocation27_spill] sm:$0xff] }
  0xbb   :  { %2394 = vmatmul.mubr.msk.f32.gmra.mxu0 %vm149_vm0, %v2904_v41  ;;  %v4551_v41 = vld [vmem:[#allocation74_spill] sm:$0xff] }
  0xbc   :  { %2490 = vmatmul.mubr.msk.f32.gmra.mxu1 %vm149_vm0, %v3399_v36  ;;  %2396 = vmatprep.mubr.msk.f32.mxu0 %vm149_vm0, %v2876_v37  ;;  %v4546_v36 = vld [vmem:[#allocation10_spill] sm:$0xff] }
  0xbd   :  { %2492 = vmatprep.mubr.msk.f32.mxu1 %vm149_vm0, %v3371_v28  ;;  %v4538_v28 = vld [vmem:[#allocation20_spill] sm:$0xff]  ;;  %v4547_v37 = vld [vmem:[#allocation46_spill] sm:$0xff] }
  0xbf   :  { %2397 = vmatmul.mubr.msk.f32.gmra.mxu0 %vm149_vm0, %v2848_v33  ;;  %v4543_v33 = vld [vmem:[#allocation52_spill] sm:$0xff] }
  0xc0   :  { %2493 = vmatmul.mubr.msk.f32.gmra.mxu1 %vm149_vm0, %v3343_v19  ;;  %2399 = vmatprep.mubr.msk.f32.mxu0 %vm149_vm0, %v2816_v29  ;;  %v4530_v19 = vld [vmem:[#allocation28_spill] sm:$0xff] }
  0xc1   :  { %2495 = vmatprep.mubr.msk.f32.mxu1 %vm149_vm0, %v3315_v17  ;;  %v4528_v17 = vld [vmem:[#allocation30_spill] sm:$0xff]  ;;  %v4539_v29 = vld [vmem:[#allocation56_spill] sm:$0xff] }
  0xc3   :  { %2400 = vmatmul.mubr.msk.f32.gmra.mxu0 %vm149_vm0, %v2783_v24  ;;  %v4535_v24 = vld [vmem:[#allocation60_spill] sm:$0xff] }
  0xc4   :  { %2496 = vmatmul.mubr.msk.f32.gmra.mxu1 %vm149_vm0, %v3287_v15  ;;  %2402 = vmatprep.mubr.msk.f32.mxu0 %vm149_vm0, %v2755_v20  ;;  %v4526_v15 = vld [vmem:[#allocation32_spill] sm:$0xff] }
  0xc5   :  { %2498 = vmatprep.mubr.msk.f32.mxu1 %vm149_vm0, %v3255_v50  ;;  %v4531_v20 = vld [vmem:[#allocation64_spill] sm:$0xff]  ;;  %v4560_v50 = vld [vmem:[#allocation29_spill] sm:$0xff] }
  0xc7   :  { %2403 = vmatmul.mubr.msk.f32.gmra.mxu0 %vm149_vm0, %v2727_v16  ;;  %v4527_v16 = vld [vmem:[#allocation68_spill] sm:$0xff] }
  0xc8   :  { %2499 = vmatmul.mubr.msk.f32.gmra.mxu1 %vm149_vm0, %v3219_v3  ;;  %2405 = vmatprep.mubr.msk.f32.mxu0 %vm149_vm0, %v4512_v0  ;;  %v4519_v3 = vld [vmem:[#allocation41_spill] sm:$0xff] }
  0xc9   :  { %2501 = vmatprep.mubr.msk.f32.mxu1 %vm149_vm0, %v4513_v1  ;;  %v4572_v0 = vld [vmem:[#allocation17_spill] sm:$0xff] }
  0xca   :  { %v4573_v1 = vld [vmem:[#allocation53_spill] sm:$0xff] }
  0xcb   :  { %2406 = vmatmul.mubr.msk.f32.gmra.mxu0 %vm149_vm0, %v4514_v2 }
  0xcc   :  { %2502 = vmatmul.mubr.msk.f32.gmra.mxu1 %vm149_vm0, %v4515_v4  ;;  %2408 = vmatprep.mubr.msk.f32.mxu0 %vm149_vm0, %v4516_v5  ;;  %v4574_v5 = vld [vmem:[#allocation15_spill] sm:$0xff] }
  0xcd   :  { %2504 = vmatprep.mubr.msk.f32.mxu1 %vm149_vm0, %v4517_v6  ;;  %v4575_v6 = vld [vmem:[#allocation51_spill] sm:$0xff] }
  0xcf   :  { %2409 = vmatmul.mubr.msk.f32.gmra.mxu0 %vm149_vm0, %v4518_v7 }
  0xd0   :  { %2505 = vmatmul.mubr.msk.f32.gmra.mxu1 %vm149_vm0, %v4519_v3  ;;  %2411 = vmatprep.mubr.msk.f32.mxu0 %vm149_vm0, %v4520_v8  ;;  %v4576_v8 = vld [vmem:[#allocation12_spill] sm:$0xff] }
  0xd1   :  { %2507 = vmatprep.mubr.msk.f32.mxu1 %vm149_vm0, %v3554_v54  ;;  %v4564_v54 = vld [vmem:[#allocation25_spill] sm:$0xff] }
  0xd3   :  { %2412 = vmatmul.mubr.msk.f32.gmra.mxu0 %vm149_vm0, %v4521_v10  ;;  %v4577_v10 = vld [vmem:[#allocation48_spill] sm:$0xff] }
  0xd4   :  { %2508 = vmatmul.mubr.msk.f32.gmra.mxu1 %vm149_vm0, %v3529_v38  ;;  %2414 = vmatprep.mubr.msk.f32.mxu0 %vm149_vm0, %v4522_v11  ;;  %v4548_v38 = vld [vmem:[#allocation7_spill] sm:$0xff] }
  0xd5   :  { %2510 = vmatprep.mubr.msk.f32.mxu1 %vm149_vm0, %v4523_v12 }
  0xd7   :  { %2415 = vmatmul.mubr.msk.f32.gmra.mxu0 %vm149_vm0, %v4524_v13  ;;  %v4578_v13 = vld [vmem:[#allocation9_spill] sm:$0xff] }
  0xd8   :  { %2511 = vmatmul.mubr.msk.f32.gmra.mxu1 %vm149_vm0, %v4525_v14  ;;  %2417 = vmatprep.mubr.msk.f32.mxu0 %vm149_vm0, %v4526_v15  ;;  %v4579_v14 = vld [vmem:[#allocation45_spill] sm:$0xff] }
  0xd9   :  { %2513 = vmatprep.mubr.msk.f32.mxu1 %vm149_vm0, %v4527_v16 }
  0xdb   :  { %2418 = vmatmul.mubr.msk.f32.gmra.mxu0 %vm149_vm0, %v4528_v17  ;;  %v4580_v17 = vld [vmem:[#allocation6_spill] sm:$0xff] }
  0xdc   :  { %2514 = vmatmul.mubr.msk.f32.gmra.mxu1 %vm149_vm0, %v4529_v18  ;;  %2420 = vmatprep.mubr.msk.f32.mxu0 %vm149_vm0, %v4530_v19  ;;  %v4581_v18 = vld [vmem:[#allocation42_spill] sm:$0xff] }
  0xdd   :  { %2516 = vmatprep.mubr.msk.f32.mxu1 %vm149_vm0, %v4531_v20 }
  0xdf   :  { %2421 = vmatmul.mubr.msk.f32.gmra.mxu0 %vm149_vm0, %v4532_v21 }
  0xe0   :  { %2517 = vmatmul.mubr.msk.f32.gmra.mxu1 %vm149_vm0, %v4533_v22  ;;  %2423 = vmatprep.mubr.msk.f32.mxu0 %vm149_vm0, %v4534_v23 }
  0xe1   :  { %2519 = vmatprep.mubr.msk.f32.mxu1 %vm149_vm0, %v4535_v24 }
  0xe3   :  { %2424 = vmatmul.mubr.msk.f32.gmra.mxu0 %vm149_vm0, %v4536_v25 }
  0xe4   :  { %2520 = vmatmul.mubr.msk.f32.gmra.mxu1 %vm149_vm0, %v4537_v27  ;;  %2426 = vmatprep.mubr.msk.f32.mxu0 %vm149_vm0, %v4538_v28 }
  0xe5   :  { %2522 = vmatprep.mubr.msk.f32.mxu1 %vm149_vm0, %v4539_v29 }
  0xe7   :  { %2427 = vmatmul.mubr.msk.f32.gmra.mxu0 %vm149_vm0, %v4540_v30 }
  0xe8   :  { %2523 = vmatmul.mubr.msk.f32.gmra.mxu1 %vm149_vm0, %v4541_v31  ;;  %2429 = vmatprep.mubr.msk.f32.mxu0 %vm149_vm0, %v4542_v32 }
  0xe9   :  { %2525 = vmatprep.mubr.msk.f32.mxu1 %vm149_vm0, %v4543_v33 }
  0xeb   :  { %2430 = vmatmul.mubr.msk.f32.gmra.mxu0 %vm149_vm0, %v4544_v34 }
  0xec   :  { %2526 = vmatmul.mubr.msk.f32.gmra.mxu1 %vm149_vm0, %v4545_v35  ;;  %2432 = vmatprep.mubr.msk.f32.mxu0 %vm149_vm0, %v4546_v36 }
  0xed   :  { %2528 = vmatprep.mubr.msk.f32.mxu1 %vm149_vm0, %v4547_v37 }
  0xef   :  { %2433 = vmatmul.mubr.msk.f32.gmra.mxu0 %vm149_vm0, %v4548_v38 }
  0xf0   :  { %2529 = vmatmul.mubr.msk.f32.gmra.mxu1 %vm149_vm0, %v4549_v39  ;;  %2435 = vmatprep.mubr.msk.f32.mxu0 %vm149_vm0, %v4550_v40 }
  0xf1   :  { %2531 = vmatprep.mubr.msk.f32.mxu1 %vm149_vm0, %v4551_v41 }
  0xf3   :  { %2436 = vmatmul.mubr.msk.f32.gmra.mxu0 %vm149_vm0, %v4552_v42 }
  0xf4   :  { %2532 = vmatmul.mubr.msk.f32.gmra.mxu1 %vm149_vm0, %v4553_v43  ;;  %2438 = vmatprep.mubr.msk.f32.mxu0 %vm149_vm0, %v4554_v44 }
  0xf5   :  { %2534 = vmatprep.mubr.msk.f32.mxu1 %vm149_vm0, %v4555_v45 }
  0xf7   :  { %2439 = vmatmul.mubr.msk.f32.gmra.mxu0 %vm149_vm0, %v4556_v46 }
  0xf8   :  { %2535 = vmatmul.mubr.msk.f32.gmra.mxu1 %vm149_vm0, %v4557_v47  ;;  %2441 = vmatprep.mubr.msk.f32.mxu0 %vm149_vm0, %v4558_v48 }
  0xf9   :  { %2537 = vmatprep.mubr.msk.f32.mxu1 %vm149_vm0, %v4559_v49 }
  0xfb   :  { %2442 = vmatmul.mubr.msk.f32.gmra.mxu0 %vm149_vm0, %v4560_v50 }
  0xfc   :  { %2538 = vmatmul.mubr.msk.f32.gmra.mxu1 %vm149_vm0, %v4561_v51  ;;  %2444 = vmatprep.mubr.msk.f32.mxu0 %vm149_vm0, %v4562_v52 }
  0xfd   :  { %2540 = vmatprep.mubr.msk.f32.mxu1 %vm149_vm0, %v4563_v53 }
  0xff   :  { %2445 = vmatmul.mubr.msk.f32.gmra.mxu0 %vm149_vm0, %v4564_v54 }
 0x100   :  { %2541 = vmatmul.mubr.msk.f32.gmra.mxu1 %vm149_vm0, %v4565_v55  ;;  %2447 = vmatprep.mubr.msk.f32.mxu0 %vm149_vm0, %v4566_v56 }
 0x101   :  { %2543 = vmatprep.mubr.msk.f32.mxu1 %vm149_vm0, %v4567_v57 }
 0x103   :  { %v612_v58 = vpop.f32.mrf.mxu0  ;;  %2448 = vmatmul.mubr.msk.f32.gmra.mxu0 %vm149_vm0, %v4568_v60 }
 0x104   :  { %v701_v59 = vpop.f32.mrf.mxu1  ;;  %2544 = vmatmul.mubr.msk.f32.gmra.mxu1 %vm149_vm0, %v4569_v61  ;;  %902 = vst [vmem:[#allocation2] sm:$0xff] %v612_v58  ;;  %2450 = vmatprep.mubr.msk.f32.mxu0 %vm149_vm0, %v4570_v62 }
 0x105   :  { %904 = vst [vmem:[#allocation2 + $0x10] sm:$0xff] %v701_v59  ;;  %2546 = vmatprep.mubr.msk.f32.mxu1 %vm149_vm0, %v4571_v63  ;;  %v614_v26 = vpop.f32.mrf.mxu0 }
 0x106   :  { %v703_v9 = vpop.f32.mrf.mxu1  ;;  %903 = vst [vmem:[#allocation2 + $0x8] sm:$0xff] %v614_v26 }
 0x107   :  { %905 = vst [vmem:[#allocation2 + $0x18] sm:$0xff] %v703_v9  ;;  %2451 = vmatmul.mubr.msk.f32.gmra.mxu0 %vm149_vm0, %v4572_v0  ;;  %v618_v2 = vpop.f32.mrf.mxu0 }
 0x108   :  { %2547 = vmatmul.mubr.msk.f32.gmra.mxu1 %vm149_vm0, %v4573_v1  ;;  %v707_v4 = vpop.f32.mrf.mxu1  ;;  %2453 = vmatprep.mubr.msk.f32.mxu0 %vm149_vm0, %v4574_v5  ;;  %910 = vst [vmem:[#allocation2 + $0x40] sm:$0xff] %v618_v2 }
 0x109   :  { %2549 = vmatprep.mubr.msk.f32.mxu1 %vm149_vm0, %v4575_v6  ;;  %912 = vst [vmem:[#allocation2 + $0x50] sm:$0xff] %v707_v4  ;;  %v620_v7 = vpop.f32.mrf.mxu0 }
 0x10a   :  { %v709_v3 = vpop.f32.mrf.mxu1  ;;  %911 = vst [vmem:[#allocation2 + $0x48] sm:$0xff] %v620_v7 }
 0x10b   :  { %913 = vst [vmem:[#allocation2 + $0x58] sm:$0xff] %v709_v3  ;;  %2454 = vmatmul.mubr.msk.f32.gmra.mxu0 %vm149_vm0, %v4576_v8  ;;  %v624_v11 = vpop.f32.mrf.mxu0 }
 0x10c   :  { %2550 = vmatmul.mubr.msk.f32.gmra.mxu1 %vm149_vm0, %v4577_v10  ;;  %v713_v12 = vpop.f32.mrf.mxu1  ;;  %2456 = vmatprep.mubr.msk.f32.mxu0 %vm149_vm0, %v4578_v13  ;;  %918 = vst [vmem:[#allocation2 + $0x80] sm:$0xff] %v624_v11 }
 0x10d   :  { %2552 = vmatprep.mubr.msk.f32.mxu1 %vm149_vm0, %v4579_v14  ;;  %920 = vst [vmem:[#allocation2 + $0x90] sm:$0xff] %v713_v12  ;;  %v626_v15 = vpop.f32.mrf.mxu0 }
 0x10e   :  { %v715_v16 = vpop.f32.mrf.mxu1  ;;  %919 = vst [vmem:[#allocation2 + $0x88] sm:$0xff] %v626_v15 }
 0x10f   :  { %921 = vst [vmem:[#allocation2 + $0x98] sm:$0xff] %v715_v16  ;;  %2457 = vmatmul.mubr.msk.f32.gmra.mxu0 %vm149_vm0, %v4580_v17  ;;  %v630_v19 = vpop.f32.mrf.mxu0 }
 0x110   :  { %2553 = vmatmul.mubr.msk.f32.gmra.mxu1 %vm149_vm0, %v4581_v18  ;;  %v719_v20 = vpop.f32.mrf.mxu1  ;;  %926 = vst [vmem:[#allocation2 + $0xc0] sm:$0xff] %v630_v19 }
 0x111   :  { %928 = vst [vmem:[#allocation2 + $0xd0] sm:$0xff] %v719_v20  ;;  %v632_v21 = vpop.f32.mrf.mxu0 }
 0x112   :  { %v721_v22 = vpop.f32.mrf.mxu1  ;;  %927 = vst [vmem:[#allocation2 + $0xc8] sm:$0xff] %v632_v21 }
 0x113   :  { %929 = vst [vmem:[#allocation2 + $0xd8] sm:$0xff] %v721_v22 }
 0x143   :  { %v790_v23 = vpop.f32.mrf.mxu0 }
 0x144   :  { %v879_v24 = vpop.f32.mrf.mxu1  ;;  %906 = vst [vmem:[#allocation2 + $0x20] sm:$0xff] %v790_v23 }
 0x145   :  { %908 = vst [vmem:[#allocation2 + $0x30] sm:$0xff] %v879_v24  ;;  %v792_v25 = vpop.f32.mrf.mxu0 }
 0x146   :  { %v881_v27 = vpop.f32.mrf.mxu1  ;;  %907 = vst [vmem:[#allocation2 + $0x28] sm:$0xff] %v792_v25 }
 0x147   :  { %909 = vst [vmem:[#allocation2 + $0x38] sm:$0xff] %v881_v27  ;;  %v796_v28 = vpop.f32.mrf.mxu0 }
 0x148   :  { %v885_v29 = vpop.f32.mrf.mxu1  ;;  %914 = vst [vmem:[#allocation2 + $0x60] sm:$0xff] %v796_v28 }
 0x149   :  { %916 = vst [vmem:[#allocation2 + $0x70] sm:$0xff] %v885_v29  ;;  %v798_v30 = vpop.f32.mrf.mxu0 }
 0x14a   :  { %v887_v31 = vpop.f32.mrf.mxu1  ;;  %915 = vst [vmem:[#allocation2 + $0x68] sm:$0xff] %v798_v30 }
 0x14b   :  { %917 = vst [vmem:[#allocation2 + $0x78] sm:$0xff] %v887_v31  ;;  %v802_v32 = vpop.f32.mrf.mxu0 }
 0x14c   :  { %v891_v33 = vpop.f32.mrf.mxu1  ;;  %922 = vst [vmem:[#allocation2 + $0xa0] sm:$0xff] %v802_v32 }
 0x14d   :  { %924 = vst [vmem:[#allocation2 + $0xb0] sm:$0xff] %v891_v33  ;;  %v804_v34 = vpop.f32.mrf.mxu0 }
 0x14e   :  { %v893_v35 = vpop.f32.mrf.mxu1  ;;  %923 = vst [vmem:[#allocation2 + $0xa8] sm:$0xff] %v804_v34 }
 0x14f   :  { %925 = vst [vmem:[#allocation2 + $0xb8] sm:$0xff] %v893_v35  ;;  %v808_v36 = vpop.f32.mrf.mxu0 }
 0x150   :  { %v897_v37 = vpop.f32.mrf.mxu1  ;;  %930 = vst [vmem:[#allocation2 + $0xe0] sm:$0xff] %v808_v36 }
 0x151   :  { %932 = vst [vmem:[#allocation2 + $0xf0] sm:$0xff] %v897_v37  ;;  %v810_v38 = vpop.f32.mrf.mxu0 }
 0x152   :  { %v899_v39 = vpop.f32.mrf.mxu1  ;;  %931 = vst [vmem:[#allocation2 + $0xe8] sm:$0xff] %v810_v38 }
 0x153   :  { %933 = vst [vmem:[#allocation2 + $0xf8] sm:$0xff] %v899_v39  ;;  %v2365_v40 = vpop.f32.mrf.mxu0 }
 0x154   :  { %v2461_v41 = vpop.f32.mrf.mxu1 }
 0x155   :  { %2577 = shalt.err (!%p2574_p4)
}
 0x156   :  { %s2589_s24 = smov 1024   ;;  %s2590_s25 = smov 64   ;;  %1644 = vst.msk [vmem:[%s4371_s4 + $0x8] sm:$0xff] %vm149_vm0, %v2365_v40  ;;  %1708 = vst.msk [vmem:[%s4371_s4 + $0x208] sm:$0xff] %vm149_vm0, %v2461_v41  ;;  %v1004_v42 = vpop.f32.mrf.mxu0  ;;  %v1324_v43 = vpop.f32.mrf.mxu1 }
 0x157   :  { %1782 = dma.vmem_to_hbm [thread:$0]  %s1777_s22, 4096, %s4370_s3, [#allocation3], %s2589_s24, %s2589_s24, %s2590_s25  }
 0x158   :  { %1643 = vst.msk [vmem:[%s4371_s4] sm:$0xff] %vm149_vm0, %v1004_v42  ;;  %1707 = vst.msk [vmem:[%s4371_s4 + $0x200] sm:$0xff] %vm149_vm0, %v1324_v43  ;;  %v2368_v44 = vpop.f32.mrf.mxu0  ;;  %v2464_v45 = vpop.f32.mrf.mxu1 }
 0x159   :  { %1646 = vst.msk [vmem:[%s4371_s4 + $0x18] sm:$0xff] %vm149_vm0, %v2368_v44  ;;  %1710 = vst.msk [vmem:[%s4371_s4 + $0x218] sm:$0xff] %vm149_vm0, %v2464_v45 }
 0x15a   :  { %v1014_v46 = vpop.f32.mrf.mxu0  ;;  %v1334_v47 = vpop.f32.mrf.mxu1 }
 0x15b   :  { %1645 = vst.msk [vmem:[%s4371_s4 + $0x10] sm:$0xff] %vm149_vm0, %v1014_v46  ;;  %1709 = vst.msk [vmem:[%s4371_s4 + $0x210] sm:$0xff] %vm149_vm0, %v1334_v47 }
 0x15c   :  { %v2371_v48 = vpop.f32.mrf.mxu0  ;;  %v2467_v49 = vpop.f32.mrf.mxu1 }
 0x15d   :  { %1648 = vst.msk [vmem:[%s4371_s4 + $0x28] sm:$0xff] %vm149_vm0, %v2371_v48  ;;  %1712 = vst.msk [vmem:[%s4371_s4 + $0x228] sm:$0xff] %vm149_vm0, %v2467_v49 }
 0x15e   :  { %v1024_v50 = vpop.f32.mrf.mxu0  ;;  %v1344_v51 = vpop.f32.mrf.mxu1 }
 0x15f   :  { %1647 = vst.msk [vmem:[%s4371_s4 + $0x20] sm:$0xff] %vm149_vm0, %v1024_v50  ;;  %1711 = vst.msk [vmem:[%s4371_s4 + $0x220] sm:$0xff] %vm149_vm0, %v1344_v51 }
 0x160   :  { %v2374_v52 = vpop.f32.mrf.mxu0  ;;  %v2470_v53 = vpop.f32.mrf.mxu1 }
 0x161   :  { %1650 = vst.msk [vmem:[%s4371_s4 + $0x38] sm:$0xff] %vm149_vm0, %v2374_v52  ;;  %1714 = vst.msk [vmem:[%s4371_s4 + $0x238] sm:$0xff] %vm149_vm0, %v2470_v53 }
 0x162   :  { %v1034_v54 = vpop.f32.mrf.mxu0  ;;  %v1354_v55 = vpop.f32.mrf.mxu1 }
 0x163   :  { %1649 = vst.msk [vmem:[%s4371_s4 + $0x30] sm:$0xff] %vm149_vm0, %v1034_v54  ;;  %1713 = vst.msk [vmem:[%s4371_s4 + $0x230] sm:$0xff] %vm149_vm0, %v1354_v55 }
 0x164   :  { %v2377_v56 = vpop.f32.mrf.mxu0  ;;  %v2473_v57 = vpop.f32.mrf.mxu1 }
 0x165   :  { %1652 = vst.msk [vmem:[%s4371_s4 + $0x48] sm:$0xff] %vm149_vm0, %v2377_v56  ;;  %1716 = vst.msk [vmem:[%s4371_s4 + $0x248] sm:$0xff] %vm149_vm0, %v2473_v57 }
 0x166   :  { %v1044_v58 = vpop.f32.mrf.mxu0  ;;  %v1364_v59 = vpop.f32.mrf.mxu1 }
 0x167   :  { %1651 = vst.msk [vmem:[%s4371_s4 + $0x40] sm:$0xff] %vm149_vm0, %v1044_v58  ;;  %1715 = vst.msk [vmem:[%s4371_s4 + $0x240] sm:$0xff] %vm149_vm0, %v1364_v59 }
 0x168   :  { %v2380_v60 = vpop.f32.mrf.mxu0  ;;  %v2476_v61 = vpop.f32.mrf.mxu1 }
 0x169   :  { %1654 = vst.msk [vmem:[%s4371_s4 + $0x58] sm:$0xff] %vm149_vm0, %v2380_v60  ;;  %1718 = vst.msk [vmem:[%s4371_s4 + $0x258] sm:$0xff] %vm149_vm0, %v2476_v61 }
 0x16a   :  { %v1054_v62 = vpop.f32.mrf.mxu0  ;;  %v1374_v63 = vpop.f32.mrf.mxu1 }
 0x16b   :  { %1653 = vst.msk [vmem:[%s4371_s4 + $0x50] sm:$0xff] %vm149_vm0, %v1054_v62  ;;  %1717 = vst.msk [vmem:[%s4371_s4 + $0x250] sm:$0xff] %vm149_vm0, %v1374_v63 }
 0x16c   :  { %v2383_v26 = vpop.f32.mrf.mxu0  ;;  %v2479_v9 = vpop.f32.mrf.mxu1 }
 0x16d   :  { %1656 = vst.msk [vmem:[%s4371_s4 + $0x68] sm:$0xff] %vm149_vm0, %v2383_v26  ;;  %1720 = vst.msk [vmem:[%s4371_s4 + $0x268] sm:$0xff] %vm149_vm0, %v2479_v9 }
 0x16e   :  { %v1064_v0 = vpop.f32.mrf.mxu0  ;;  %v1384_v1 = vpop.f32.mrf.mxu1 }
 0x16f   :  { %1655 = vst.msk [vmem:[%s4371_s4 + $0x60] sm:$0xff] %vm149_vm0, %v1064_v0  ;;  %1719 = vst.msk [vmem:[%s4371_s4 + $0x260] sm:$0xff] %vm149_vm0, %v1384_v1 }
 0x170   :  { %v2386_v2 = vpop.f32.mrf.mxu0  ;;  %v2482_v4 = vpop.f32.mrf.mxu1 }
 0x171   :  { %1658 = vst.msk [vmem:[%s4371_s4 + $0x78] sm:$0xff] %vm149_vm0, %v2386_v2  ;;  %1722 = vst.msk [vmem:[%s4371_s4 + $0x278] sm:$0xff] %vm149_vm0, %v2482_v4 }
 0x172   :  { %v1074_v5 = vpop.f32.mrf.mxu0  ;;  %v1394_v6 = vpop.f32.mrf.mxu1 }
 0x173   :  { %1657 = vst.msk [vmem:[%s4371_s4 + $0x70] sm:$0xff] %vm149_vm0, %v1074_v5  ;;  %1721 = vst.msk [vmem:[%s4371_s4 + $0x270] sm:$0xff] %vm149_vm0, %v1394_v6 }
 0x174   :  { %v2389_v7 = vpop.f32.mrf.mxu0  ;;  %v2485_v3 = vpop.f32.mrf.mxu1 }
 0x175   :  { %1660 = vst.msk [vmem:[%s4371_s4 + $0x88] sm:$0xff] %vm149_vm0, %v2389_v7  ;;  %1724 = vst.msk [vmem:[%s4371_s4 + $0x288] sm:$0xff] %vm149_vm0, %v2485_v3 }
 0x176   :  { %v1084_v8 = vpop.f32.mrf.mxu0  ;;  %v1404_v10 = vpop.f32.mrf.mxu1 }
 0x177   :  { %1659 = vst.msk [vmem:[%s4371_s4 + $0x80] sm:$0xff] %vm149_vm0, %v1084_v8  ;;  %1723 = vst.msk [vmem:[%s4371_s4 + $0x280] sm:$0xff] %vm149_vm0, %v1404_v10 }
 0x178   :  { %v2392_v11 = vpop.f32.mrf.mxu0  ;;  %v2488_v12 = vpop.f32.mrf.mxu1 }
 0x179   :  { %1662 = vst.msk [vmem:[%s4371_s4 + $0x98] sm:$0xff] %vm149_vm0, %v2392_v11  ;;  %1726 = vst.msk [vmem:[%s4371_s4 + $0x298] sm:$0xff] %vm149_vm0, %v2488_v12 }
 0x17a   :  { %v1094_v13 = vpop.f32.mrf.mxu0  ;;  %v1414_v14 = vpop.f32.mrf.mxu1 }
 0x17b   :  { %1661 = vst.msk [vmem:[%s4371_s4 + $0x90] sm:$0xff] %vm149_vm0, %v1094_v13  ;;  %1725 = vst.msk [vmem:[%s4371_s4 + $0x290] sm:$0xff] %vm149_vm0, %v1414_v14 }
 0x17c   :  { %v2395_v15 = vpop.f32.mrf.mxu0  ;;  %v2491_v16 = vpop.f32.mrf.mxu1 }
 0x17d   :  { %1664 = vst.msk [vmem:[%s4371_s4 + $0xa8] sm:$0xff] %vm149_vm0, %v2395_v15  ;;  %1728 = vst.msk [vmem:[%s4371_s4 + $0x2a8] sm:$0xff] %vm149_vm0, %v2491_v16 }
 0x17e   :  { %v1104_v17 = vpop.f32.mrf.mxu0  ;;  %v1424_v18 = vpop.f32.mrf.mxu1 }
 0x17f   :  { %1663 = vst.msk [vmem:[%s4371_s4 + $0xa0] sm:$0xff] %vm149_vm0, %v1104_v17  ;;  %1727 = vst.msk [vmem:[%s4371_s4 + $0x2a0] sm:$0xff] %vm149_vm0, %v1424_v18 }
 0x180   :  { %v2398_v19 = vpop.f32.mrf.mxu0  ;;  %v2494_v20 = vpop.f32.mrf.mxu1 }
 0x181   :  { %1666 = vst.msk [vmem:[%s4371_s4 + $0xb8] sm:$0xff] %vm149_vm0, %v2398_v19  ;;  %1730 = vst.msk [vmem:[%s4371_s4 + $0x2b8] sm:$0xff] %vm149_vm0, %v2494_v20 }
 0x182   :  { %v1114_v21 = vpop.f32.mrf.mxu0  ;;  %v1434_v22 = vpop.f32.mrf.mxu1 }
 0x183   :  { %1665 = vst.msk [vmem:[%s4371_s4 + $0xb0] sm:$0xff] %vm149_vm0, %v1114_v21  ;;  %1729 = vst.msk [vmem:[%s4371_s4 + $0x2b0] sm:$0xff] %vm149_vm0, %v1434_v22 }
 0x184   :  { %v2401_v23 = vpop.f32.mrf.mxu0  ;;  %v2497_v24 = vpop.f32.mrf.mxu1 }
 0x185   :  { %1668 = vst.msk [vmem:[%s4371_s4 + $0xc8] sm:$0xff] %vm149_vm0, %v2401_v23  ;;  %1732 = vst.msk [vmem:[%s4371_s4 + $0x2c8] sm:$0xff] %vm149_vm0, %v2497_v24 }
 0x186   :  { %v1124_v25 = vpop.f32.mrf.mxu0  ;;  %v1444_v27 = vpop.f32.mrf.mxu1 }
 0x187   :  { %1667 = vst.msk [vmem:[%s4371_s4 + $0xc0] sm:$0xff] %vm149_vm0, %v1124_v25  ;;  %1731 = vst.msk [vmem:[%s4371_s4 + $0x2c0] sm:$0xff] %vm149_vm0, %v1444_v27 }
 0x188   :  { %v2404_v28 = vpop.f32.mrf.mxu0  ;;  %v2500_v29 = vpop.f32.mrf.mxu1 }
 0x189   :  { %1670 = vst.msk [vmem:[%s4371_s4 + $0xd8] sm:$0xff] %vm149_vm0, %v2404_v28  ;;  %1734 = vst.msk [vmem:[%s4371_s4 + $0x2d8] sm:$0xff] %vm149_vm0, %v2500_v29 }
 0x18a   :  { %v1134_v30 = vpop.f32.mrf.mxu0  ;;  %v1454_v31 = vpop.f32.mrf.mxu1 }
 0x18b   :  { %1669 = vst.msk [vmem:[%s4371_s4 + $0xd0] sm:$0xff] %vm149_vm0, %v1134_v30  ;;  %1733 = vst.msk [vmem:[%s4371_s4 + $0x2d0] sm:$0xff] %vm149_vm0, %v1454_v31 }
 0x18c   :  { %v2407_v32 = vpop.f32.mrf.mxu0  ;;  %v2503_v33 = vpop.f32.mrf.mxu1 }
 0x18d   :  { %1672 = vst.msk [vmem:[%s4371_s4 + $0xe8] sm:$0xff] %vm149_vm0, %v2407_v32  ;;  %1736 = vst.msk [vmem:[%s4371_s4 + $0x2e8] sm:$0xff] %vm149_vm0, %v2503_v33 }
 0x18e   :  { %v1144_v34 = vpop.f32.mrf.mxu0  ;;  %v1464_v35 = vpop.f32.mrf.mxu1 }
 0x18f   :  { %1671 = vst.msk [vmem:[%s4371_s4 + $0xe0] sm:$0xff] %vm149_vm0, %v1144_v34  ;;  %1735 = vst.msk [vmem:[%s4371_s4 + $0x2e0] sm:$0xff] %vm149_vm0, %v1464_v35 }
 0x190   :  { %v2410_v36 = vpop.f32.mrf.mxu0  ;;  %v2506_v37 = vpop.f32.mrf.mxu1 }
 0x191   :  { %1674 = vst.msk [vmem:[%s4371_s4 + $0xf8] sm:$0xff] %vm149_vm0, %v2410_v36  ;;  %1738 = vst.msk [vmem:[%s4371_s4 + $0x2f8] sm:$0xff] %vm149_vm0, %v2506_v37 }
 0x192   :  { %v1154_v38 = vpop.f32.mrf.mxu0  ;;  %v1474_v39 = vpop.f32.mrf.mxu1 }
 0x193   :  { %1673 = vst.msk [vmem:[%s4371_s4 + $0xf0] sm:$0xff] %vm149_vm0, %v1154_v38  ;;  %1737 = vst.msk [vmem:[%s4371_s4 + $0x2f0] sm:$0xff] %vm149_vm0, %v1474_v39 }
 0x194   :  { %v2413_v40 = vpop.f32.mrf.mxu0  ;;  %v2509_v41 = vpop.f32.mrf.mxu1 }
 0x195   :  { %1676 = vst.msk [vmem:[%s4371_s4 + $0x108] sm:$0xff] %vm149_vm0, %v2413_v40  ;;  %1740 = vst.msk [vmem:[%s4371_s4 + $0x308] sm:$0xff] %vm149_vm0, %v2509_v41 }
 0x196   :  { %v1164_v42 = vpop.f32.mrf.mxu0  ;;  %v1484_v43 = vpop.f32.mrf.mxu1 }
 0x197   :  { %1675 = vst.msk [vmem:[%s4371_s4 + $0x100] sm:$0xff] %vm149_vm0, %v1164_v42  ;;  %1739 = vst.msk [vmem:[%s4371_s4 + $0x300] sm:$0xff] %vm149_vm0, %v1484_v43 }
 0x198   :  { %v2416_v44 = vpop.f32.mrf.mxu0  ;;  %v2512_v45 = vpop.f32.mrf.mxu1 }
 0x199   :  { %1678 = vst.msk [vmem:[%s4371_s4 + $0x118] sm:$0xff] %vm149_vm0, %v2416_v44  ;;  %1742 = vst.msk [vmem:[%s4371_s4 + $0x318] sm:$0xff] %vm149_vm0, %v2512_v45 }
 0x19a   :  { %v1174_v46 = vpop.f32.mrf.mxu0  ;;  %v1494_v47 = vpop.f32.mrf.mxu1 }
 0x19b   :  { %1677 = vst.msk [vmem:[%s4371_s4 + $0x110] sm:$0xff] %vm149_vm0, %v1174_v46  ;;  %1741 = vst.msk [vmem:[%s4371_s4 + $0x310] sm:$0xff] %vm149_vm0, %v1494_v47 }
 0x19c   :  { %v2419_v48 = vpop.f32.mrf.mxu0  ;;  %v2515_v49 = vpop.f32.mrf.mxu1 }
 0x19d   :  { %1680 = vst.msk [vmem:[%s4371_s4 + $0x128] sm:$0xff] %vm149_vm0, %v2419_v48  ;;  %1744 = vst.msk [vmem:[%s4371_s4 + $0x328] sm:$0xff] %vm149_vm0, %v2515_v49 }
 0x19e   :  { %v1184_v50 = vpop.f32.mrf.mxu0  ;;  %v1504_v51 = vpop.f32.mrf.mxu1 }
 0x19f   :  { %1679 = vst.msk [vmem:[%s4371_s4 + $0x120] sm:$0xff] %vm149_vm0, %v1184_v50  ;;  %1743 = vst.msk [vmem:[%s4371_s4 + $0x320] sm:$0xff] %vm149_vm0, %v1504_v51 }
 0x1a0   :  { %v2422_v52 = vpop.f32.mrf.mxu0  ;;  %v2518_v53 = vpop.f32.mrf.mxu1 }
 0x1a1   :  { %1682 = vst.msk [vmem:[%s4371_s4 + $0x138] sm:$0xff] %vm149_vm0, %v2422_v52  ;;  %1746 = vst.msk [vmem:[%s4371_s4 + $0x338] sm:$0xff] %vm149_vm0, %v2518_v53 }
 0x1a2   :  { %v1194_v54 = vpop.f32.mrf.mxu0  ;;  %v1514_v55 = vpop.f32.mrf.mxu1 }
 0x1a3   :  { %1681 = vst.msk [vmem:[%s4371_s4 + $0x130] sm:$0xff] %vm149_vm0, %v1194_v54  ;;  %1745 = vst.msk [vmem:[%s4371_s4 + $0x330] sm:$0xff] %vm149_vm0, %v1514_v55 }
 0x1a4   :  { %v2425_v56 = vpop.f32.mrf.mxu0  ;;  %v2521_v57 = vpop.f32.mrf.mxu1 }
 0x1a5   :  { %1684 = vst.msk [vmem:[%s4371_s4 + $0x148] sm:$0xff] %vm149_vm0, %v2425_v56  ;;  %1748 = vst.msk [vmem:[%s4371_s4 + $0x348] sm:$0xff] %vm149_vm0, %v2521_v57 }
 0x1a6   :  { %v1204_v58 = vpop.f32.mrf.mxu0  ;;  %v1524_v59 = vpop.f32.mrf.mxu1 }
 0x1a7   :  { %1683 = vst.msk [vmem:[%s4371_s4 + $0x140] sm:$0xff] %vm149_vm0, %v1204_v58  ;;  %1747 = vst.msk [vmem:[%s4371_s4 + $0x340] sm:$0xff] %vm149_vm0, %v1524_v59 }
 0x1a8   :  { %v2428_v60 = vpop.f32.mrf.mxu0  ;;  %v2524_v61 = vpop.f32.mrf.mxu1 }
 0x1a9   :  { %1686 = vst.msk [vmem:[%s4371_s4 + $0x158] sm:$0xff] %vm149_vm0, %v2428_v60  ;;  %1750 = vst.msk [vmem:[%s4371_s4 + $0x358] sm:$0xff] %vm149_vm0, %v2524_v61 }
 0x1aa   :  { %v1214_v62 = vpop.f32.mrf.mxu0  ;;  %v1534_v63 = vpop.f32.mrf.mxu1 }
 0x1ab   :  { %1685 = vst.msk [vmem:[%s4371_s4 + $0x150] sm:$0xff] %vm149_vm0, %v1214_v62  ;;  %1749 = vst.msk [vmem:[%s4371_s4 + $0x350] sm:$0xff] %vm149_vm0, %v1534_v63 }
 0x1ac   :  { %v2431_v26 = vpop.f32.mrf.mxu0  ;;  %v2527_v9 = vpop.f32.mrf.mxu1 }
 0x1ad   :  { %1688 = vst.msk [vmem:[%s4371_s4 + $0x168] sm:$0xff] %vm149_vm0, %v2431_v26  ;;  %1752 = vst.msk [vmem:[%s4371_s4 + $0x368] sm:$0xff] %vm149_vm0, %v2527_v9 }
 0x1ae   :  { %v1224_v0 = vpop.f32.mrf.mxu0  ;;  %v1544_v1 = vpop.f32.mrf.mxu1 }
 0x1af   :  { %1687 = vst.msk [vmem:[%s4371_s4 + $0x160] sm:$0xff] %vm149_vm0, %v1224_v0  ;;  %1751 = vst.msk [vmem:[%s4371_s4 + $0x360] sm:$0xff] %vm149_vm0, %v1544_v1 }
 0x1b0   :  { %v2434_v2 = vpop.f32.mrf.mxu0  ;;  %v2530_v4 = vpop.f32.mrf.mxu1 }
 0x1b1   :  { %1690 = vst.msk [vmem:[%s4371_s4 + $0x178] sm:$0xff] %vm149_vm0, %v2434_v2  ;;  %1754 = vst.msk [vmem:[%s4371_s4 + $0x378] sm:$0xff] %vm149_vm0, %v2530_v4 }
 0x1b2   :  { %v1234_v5 = vpop.f32.mrf.mxu0  ;;  %v1554_v6 = vpop.f32.mrf.mxu1 }
 0x1b3   :  { %1689 = vst.msk [vmem:[%s4371_s4 + $0x170] sm:$0xff] %vm149_vm0, %v1234_v5  ;;  %1753 = vst.msk [vmem:[%s4371_s4 + $0x370] sm:$0xff] %vm149_vm0, %v1554_v6 }
 0x1b4   :  { %v2437_v7 = vpop.f32.mrf.mxu0  ;;  %v2533_v3 = vpop.f32.mrf.mxu1 }
 0x1b5   :  { %1692 = vst.msk [vmem:[%s4371_s4 + $0x188] sm:$0xff] %vm149_vm0, %v2437_v7  ;;  %1756 = vst.msk [vmem:[%s4371_s4 + $0x388] sm:$0xff] %vm149_vm0, %v2533_v3 }
 0x1b6   :  { %v1244_v8 = vpop.f32.mrf.mxu0  ;;  %v1564_v10 = vpop.f32.mrf.mxu1 }
 0x1b7   :  { %1691 = vst.msk [vmem:[%s4371_s4 + $0x180] sm:$0xff] %vm149_vm0, %v1244_v8  ;;  %1755 = vst.msk [vmem:[%s4371_s4 + $0x380] sm:$0xff] %vm149_vm0, %v1564_v10 }
 0x1b8   :  { %v2440_v11 = vpop.f32.mrf.mxu0  ;;  %v2536_v12 = vpop.f32.mrf.mxu1 }
 0x1b9   :  { %1694 = vst.msk [vmem:[%s4371_s4 + $0x198] sm:$0xff] %vm149_vm0, %v2440_v11  ;;  %1758 = vst.msk [vmem:[%s4371_s4 + $0x398] sm:$0xff] %vm149_vm0, %v2536_v12 }
 0x1ba   :  { %v1254_v13 = vpop.f32.mrf.mxu0  ;;  %v1574_v14 = vpop.f32.mrf.mxu1 }
 0x1bb   :  { %1693 = vst.msk [vmem:[%s4371_s4 + $0x190] sm:$0xff] %vm149_vm0, %v1254_v13  ;;  %1757 = vst.msk [vmem:[%s4371_s4 + $0x390] sm:$0xff] %vm149_vm0, %v1574_v14 }
 0x1bc   :  { %v2443_v15 = vpop.f32.mrf.mxu0  ;;  %v2539_v16 = vpop.f32.mrf.mxu1 }
 0x1bd   :  { %1696 = vst.msk [vmem:[%s4371_s4 + $0x1a8] sm:$0xff] %vm149_vm0, %v2443_v15  ;;  %1760 = vst.msk [vmem:[%s4371_s4 + $0x3a8] sm:$0xff] %vm149_vm0, %v2539_v16 }
 0x1be   :  { %v1264_v17 = vpop.f32.mrf.mxu0  ;;  %v1584_v18 = vpop.f32.mrf.mxu1 }
 0x1bf   :  { %1695 = vst.msk [vmem:[%s4371_s4 + $0x1a0] sm:$0xff] %vm149_vm0, %v1264_v17  ;;  %1759 = vst.msk [vmem:[%s4371_s4 + $0x3a0] sm:$0xff] %vm149_vm0, %v1584_v18 }
 0x1c0   :  { %v2446_v19 = vpop.f32.mrf.mxu0  ;;  %v2542_v20 = vpop.f32.mrf.mxu1 }
 0x1c1   :  { %1698 = vst.msk [vmem:[%s4371_s4 + $0x1b8] sm:$0xff] %vm149_vm0, %v2446_v19  ;;  %1762 = vst.msk [vmem:[%s4371_s4 + $0x3b8] sm:$0xff] %vm149_vm0, %v2542_v20 }
 0x1c2   :  { %v1274_v21 = vpop.f32.mrf.mxu0  ;;  %v1594_v22 = vpop.f32.mrf.mxu1 }
 0x1c3   :  { %1697 = vst.msk [vmem:[%s4371_s4 + $0x1b0] sm:$0xff] %vm149_vm0, %v1274_v21  ;;  %1761 = vst.msk [vmem:[%s4371_s4 + $0x3b0] sm:$0xff] %vm149_vm0, %v1594_v22 }
 0x1c4   :  { %v2449_v23 = vpop.f32.mrf.mxu0  ;;  %v2545_v24 = vpop.f32.mrf.mxu1 }
 0x1c5   :  { %1700 = vst.msk [vmem:[%s4371_s4 + $0x1c8] sm:$0xff] %vm149_vm0, %v2449_v23  ;;  %1764 = vst.msk [vmem:[%s4371_s4 + $0x3c8] sm:$0xff] %vm149_vm0, %v2545_v24 }
 0x1c6   :  { %v1284_v25 = vpop.f32.mrf.mxu0  ;;  %v1604_v27 = vpop.f32.mrf.mxu1 }
 0x1c7   :  { %1699 = vst.msk [vmem:[%s4371_s4 + $0x1c0] sm:$0xff] %vm149_vm0, %v1284_v25  ;;  %1763 = vst.msk [vmem:[%s4371_s4 + $0x3c0] sm:$0xff] %vm149_vm0, %v1604_v27 }
 0x1c8   :  { %v2452_v28 = vpop.f32.mrf.mxu0  ;;  %v2548_v29 = vpop.f32.mrf.mxu1 }
 0x1c9   :  { %1702 = vst.msk [vmem:[%s4371_s4 + $0x1d8] sm:$0xff] %vm149_vm0, %v2452_v28  ;;  %1766 = vst.msk [vmem:[%s4371_s4 + $0x3d8] sm:$0xff] %vm149_vm0, %v2548_v29 }
 0x1ca   :  { %v1294_v30 = vpop.f32.mrf.mxu0  ;;  %v1614_v31 = vpop.f32.mrf.mxu1 }
 0x1cb   :  { %1701 = vst.msk [vmem:[%s4371_s4 + $0x1d0] sm:$0xff] %vm149_vm0, %v1294_v30  ;;  %1765 = vst.msk [vmem:[%s4371_s4 + $0x3d0] sm:$0xff] %vm149_vm0, %v1614_v31 }
 0x1cc   :  { %v2455_v32 = vpop.f32.mrf.mxu0  ;;  %v2551_v33 = vpop.f32.mrf.mxu1 }
 0x1cd   :  { %1704 = vst.msk [vmem:[%s4371_s4 + $0x1e8] sm:$0xff] %vm149_vm0, %v2455_v32  ;;  %1768 = vst.msk [vmem:[%s4371_s4 + $0x3e8] sm:$0xff] %vm149_vm0, %v2551_v33 }
 0x1ce   :  { %v1304_v34 = vpop.f32.mrf.mxu0  ;;  %v1624_v35 = vpop.f32.mrf.mxu1 }
 0x1cf   :  { %1703 = vst.msk [vmem:[%s4371_s4 + $0x1e0] sm:$0xff] %vm149_vm0, %v1304_v34  ;;  %1767 = vst.msk [vmem:[%s4371_s4 + $0x3e0] sm:$0xff] %vm149_vm0, %v1624_v35 }
 0x1d0   :  { %v2458_v36 = vpop.f32.mrf.mxu0  ;;  %v2554_v37 = vpop.f32.mrf.mxu1 }
 0x1d1   :  { %1706 = vst.msk [vmem:[%s4371_s4 + $0x1f8] sm:$0xff] %vm149_vm0, %v2458_v36  ;;  %1770 = vst.msk [vmem:[%s4371_s4 + $0x3f8] sm:$0xff] %vm149_vm0, %v2554_v37 }
 0x1d2   :  { %v1314_v38 = vpop.f32.mrf.mxu0  ;;  %v1634_v39 = vpop.f32.mrf.mxu1 }
 0x1d3   :  { %1705 = vst.msk [vmem:[%s4371_s4 + $0x1f0] sm:$0xff] %vm149_vm0, %v1314_v38  ;;  %1769 = vst.msk [vmem:[%s4371_s4 + $0x3f0] sm:$0xff] %vm149_vm0, %v1634_v39 }
 0x1d4   :  { %2586 = dma.done.wait [#allocation3], 4096  }
 0x1d5   :  { %2587 = vsyncadd [#allocation3], 4294963200 }
 0x1d6   :  { %1790 = vsyncpa [#allocation3], 1 }

</bundles_post_ra>
